<compile_context>
chip_gen: v7x
topology: tpu7x:2x2x1
jax: 0.10.0
libtpu: 0.0.40
codegen_flags: <defaults>
</compile_context>

<pallas_src>
import functools

import jax
import jax.numpy as jnp
from jax.experimental import pallas as pl
from jax.experimental.pallas import tpu as pltpu

# -----------------------------  configuration  ------------------------------
N_NODES = 32
IN_CH = 8
HID = 8                # hid_units
N_HEADS = (2, 1)       # n_heads
OUT_CH = 4             # out_channels
DROPOUT = 0.6          # eval mode -> identity
NEG_SLOPE = 0.2        # GATConv default leaky_relu slope
N_EDGES = 96
NEG_BIG = -1e30


# -----------------------------  Pallas kernel  -------------------------------
def _multi_head_softmax_agg(xp3, asrc3, adst3, adj_bias):
    """All-heads-at-once masked softmax attention + aggregation.

    xp3:      [H, N, F]  projected features (f32)
    asrc3:    [H, 1, F]  source attention vectors
    adst3:    [H, 1, F]  destination attention vectors
    adj_bias: [N, N]     additive mask (0 on edges / -1e30 elsewhere)
    returns   [H, N, F]  sum_j alpha[h,i,j] * xp3[h,j]   (softmax over j)
    """
    a_src = jnp.sum(xp3 * asrc3, axis=-1)                    # [H, N]
    a_dst = jnp.sum(xp3 * adst3, axis=-1)                    # [H, N]
    e = a_dst[:, :, None] + a_src[:, None, :]                # [H, N, N]
    e = jnp.maximum(e, NEG_SLOPE * e)                        # leaky_relu (1 vmax)
    e = e + adj_bias[None, :, :]                             # additive -inf mask
    e = e - jnp.max(e, axis=-1, keepdims=True)               # finite (self-loops)
    p = jnp.exp(e)                                           # masked -> 0
    denom = jnp.sum(p, axis=-1, keepdims=True)               # [H, N, 1]
    agg = jnp.einsum("hij,hjf->hif",
                     p.astype(jnp.bfloat16), xp3.astype(jnp.bfloat16),
                     preferred_element_type=jnp.float32)     # [H, N, F]
    return agg / denom                                       # exact normalization


def _spgat_kernel(x_ref, adjb_ref, slab1_ref, slab2_ref, out_ref, *,
                  f_in, heads, f1, f2):
    """Fused SpGAT forward on the full (small) graph.

    x_ref:     [N, F_in]          adjb_ref:  [N, N] additive mask (0 / -1e30)
    slab1_ref: [H, F_in+3, f1]    rows: W1 | a_src | a_dst | bias   (per head)
    slab2_ref: [H*f1+3, f2]       rows: W2 | a_src | a_dst | bias
    out_ref:   [N, f2]
    """
    n = x_ref.shape[0]
    x = x_ref[...]                                           # [N, F_in]  f32
    adj_bias = adjb_ref[...]                                 # [N, N]

    # ---- unpack parameter slabs (static slices, 2 DMAs total) --------------
    s1 = slab1_ref[...]                                      # [H, F_in+3, f1]
    w1_3 = s1[:, :f_in, :]                                   # [H, F_in, f1]
    asrc1 = s1[:, f_in:f_in + 1, :]                          # [H, 1, f1]
    adst1 = s1[:, f_in + 1:f_in + 2, :]                      # [H, 1, f1]
    b1_3 = s1[:, f_in + 2:f_in + 3, :]                       # [H, 1, f1]

    s2 = slab2_ref[...]                                      # [H*f1+3, f2]
    w2 = s2[:heads * f1, :]                                  # [H*f1, f2]
    asrc2 = s2[heads * f1:heads * f1 + 1, :]                 # [1, f2]
    adst2 = s2[heads * f1 + 1:heads * f1 + 2, :]             # [1, f2]
    b2 = s2[heads * f1 + 2:heads * f1 + 3, :]                # [1, f2]

    # ---- layer 1: all first-layer modules / heads, fully batched -----------
    xb3 = jnp.broadcast_to(x.astype(jnp.bfloat16)[None], (heads, n, f_in))
    xp3 = jnp.einsum("hnf,hfd->hnd", xb3, w1_3.astype(jnp.bfloat16),
                     preferred_element_type=jnp.float32)     # [H, N, f1]
    h1_3 = _multi_head_softmax_agg(xp3, asrc1, adst1, adj_bias) + b1_3
    # ELU (negative branch only; exp arg clamped <= 0 so no inf/NaN hazard)
    h1_3 = jnp.where(h1_3 > 0.0, h1_3,
                     jnp.exp(jnp.minimum(h1_3, 0.0)) - 1.0)
    # F.dropout(..., training=False) -> identity

    # ---- layer 2 projection: head-concat folded into a sum of matmuls ------
    # concat([h1_0 .. h1_{H-1}], axis=1) @ W2 == sum_h h1_h @ W2[h*f1:(h+1)*f1]
    xp2 = jnp.zeros((n, f2), jnp.float32)
    for h in range(heads):
        xp2 = xp2 + jnp.dot(h1_3[h].astype(jnp.bfloat16),
                            w2[h * f1:(h + 1) * f1, :].astype(jnp.bfloat16),
                            preferred_element_type=jnp.float32)

    # ---- layer 2: out_attention (heads=1, concat=False) --------------------
    out = _multi_head_softmax_agg(xp2[None], asrc2[None], adst2[None],
                                  adj_bias)[0] + b2          # [N, f2]
    # TODO(synk): if n_heads[-1] > 1 this needs head-averaging; config uses 1.

    # ---- log_softmax over features; single small store ---------------------
    m = jnp.max(out, axis=-1, keepdims=True)
    s = out - m
    out = s - jnp.log(jnp.sum(jnp.exp(s), axis=-1, keepdims=True))
    out_ref[...] = out.astype(out_ref.dtype)


# -----------------------------  wrapper  -------------------------------------
def spgat_forward(x, adj_bias, slab1, slab2):
    n, f_in = x.shape
    heads, f1 = slab1.shape[0], slab1.shape[2]
    f2 = slab2.shape[1]
    assert slab1.shape[1] == f_in + 3
    assert slab2.shape[0] == heads * f1 + 3

    kernel = functools.partial(_spgat_kernel, f_in=f_in, heads=heads,
                               f1=f1, f2=f2)
    vmem = lambda: pl.BlockSpec(memory_space=pltpu.MemorySpace.VMEM)
    args = (x, adj_bias, slab1, slab2)

    # honest (small) cost estimate so XLA can schedule around the custom call
    flops = (2 * heads * n * f_in * f1        # layer-1 projection
             + 4 * heads * n * f1             # layer-1 attention logits
             + 2 * heads * n * n * f1         # layer-1 aggregation
             + 2 * heads * n * f1 * f2        # layer-2 projection
             + 4 * n * f2                     # layer-2 attention logits
             + 2 * n * n * f2)                # layer-2 aggregation
    transcendentals = heads * n * n + n * n + heads * n * f1 + n * f2 + n
    bytes_accessed = sum(int(a.size) * a.dtype.itemsize for a in args) \
        + n * f2 * 4

    # TODO(synk): for a batch of B graphs add grid=(B,) with per-graph
    #             index_maps and dimension_semantics=("parallel",).
    return pl.pallas_call(
        kernel,
        out_shape=jax.ShapeDtypeStruct((n, f2), jnp.float32),
        in_specs=[vmem() for _ in args],
        out_specs=vmem(),
        cost_estimate=pl.CostEstimate(flops=int(flops),
                                      transcendentals=int(transcendentals),
                                      bytes_accessed=int(bytes_accessed)),
    )(*args)


# -----------------------------  parameter init  ------------------------------
def _glorot(key, shape):
    fan_in = shape[0]
    fan_out = shape[1] if len(shape) > 1 else shape[0]
    lim = (6.0 / (fan_in + fan_out)) ** 0.5
    return jax.random.uniform(key, shape, jnp.float32, -lim, lim)


def init_params(key):
    """Per-module params mirroring SpGAT(in, out, hid_units=[8], n_heads=[2,1])."""
    params = {"attentions": [], "out": None}
    h0 = N_HEADS[0]
    for _ in range(h0):
        key, k1, k2, k3 = jax.random.split(key, 4)
        params["attentions"].append(dict(
            W=_glorot(k1, (IN_CH, h0 * HID)),
            asrc=_glorot(k2, (h0, HID)),
            adst=_glorot(k3, (h0, HID)),
            bias=jnp.zeros((1, h0 * HID), jnp.float32),
        ))
    # NOTE: reference module's out_attention in_dim (hid_units * n_heads[-2]) is
    # inconsistent with the actual concat width; use the actual width (runnable).
    concat_dim = h0 * (h0 * HID)
    key, k1, k2, k3 = jax.random.split(key, 4)
    h_last = N_HEADS[-1]
    params["out"] = dict(
        W=_glorot(k1, (concat_dim, h_last * OUT_CH)),
        asrc=_glorot(k2, (h_last, OUT_CH)),
        adst=_glorot(k3, (h_last, OUT_CH)),
        bias=jnp.zeros((1, OUT_CH), jnp.float32),
    )
    return params


def prepare_packed_params(params):
    """Pack everything into 2 slabs: layer-1 [H, F_in+3, f1], layer-2 [H*f1+3, f2].

    Global head order matches the PyTorch concat:
      module0-head0, module0-head1, module1-head0, module1-head1.
    """
    mods = params["attentions"]
    w1_cat = jnp.concatenate([m["W"] for m in mods], axis=1)       # [F_in, H*f1]
    b1_cat = jnp.concatenate([m["bias"] for m in mods], axis=1)    # [1, H*f1]
    asrc_all = jnp.concatenate([m["asrc"] for m in mods], axis=0)  # [H, f1]
    adst_all = jnp.concatenate([m["adst"] for m in mods], axis=0)  # [H, f1]
    heads = asrc_all.shape[0]

    w1_3 = w1_cat.reshape(IN_CH, heads, HID).transpose(1, 0, 2)    # [H, F_in, f1]
    b1_3 = b1_cat.reshape(heads, HID)                              # [H, f1]
    slab1 = jnp.concatenate(
        [w1_3, asrc_all[:, None, :], adst_all[:, None, :], b1_3[:, None, :]],
        axis=1).astype(jnp.float32)                                # [H, F_in+3, f1]

    p = params["out"]
    slab2 = jnp.concatenate([p["W"], p["asrc"], p["adst"], p["bias"]],
                            axis=0).astype(jnp.float32)            # [H*f1+3, f2]
    return slab1, slab2


# -----------------------------  main  -----------------------------------------
if __name__ == "__main__":
    key = jax.random.PRNGKey(0)
    kx, ke1, ke2, kp = jax.random.split(key, 4)

    x = jax.random.normal(kx, (N_NODES, IN_CH), jnp.float32)

    # data.edge_index equivalent: random directed edges [2, E]
    src = jax.random.randint(ke1, (N_EDGES,), 0, N_NODES)
    dst = jax.random.randint(ke2, (N_EDGES,), 0, N_NODES)

    # dense adjacency mask adj[dst, src] = 1, plus self loops (GATConv default).
    # Self-loops are REQUIRED: they keep every softmax row non-empty.
    adj = jnp.zeros((N_NODES, N_NODES), jnp.float32).at[dst, src].set(1.0)
    adj = jnp.maximum(adj, jnp.eye(N_NODES, dtype=jnp.float32))
    # additive softmax mask, built once, shared by both layers inside the kernel
    adj_bias = jnp.where(adj > 0.0, 0.0, NEG_BIG).astype(jnp.float32)

    params = init_params(kp)
    slab1, slab2 = prepare_packed_params(params)

    out = spgat_forward(x, adj_bias, slab1, slab2)
    out = jax.block_until_ready(out)

    assert out.shape == (N_NODES, OUT_CH)
    assert bool(jnp.all(jnp.isfinite(out)))
    # log_softmax rows should exponentiate-sum to ~1
    assert bool(jnp.allclose(jnp.sum(jnp.exp(out), axis=1), 1.0, atol=1e-4))
    print("KERNEL_OK")
</pallas_src>

<mosaic_0001>
module attributes {stable_mosaic.version = 11 : i64} {
  func.func @_spgat_kernel(%arg0: memref<32x8xf32, #tpu.memory_space<vmem>>, %arg1: memref<32x32xf32, #tpu.memory_space<vmem>>, %arg2: memref<4x11x8xf32, #tpu.memory_space<vmem>>, %arg3: memref<35x4xf32, #tpu.memory_space<vmem>>, %arg4: memref<32x4xf32, #tpu.memory_space<vmem>>) attributes {dimension_semantics = [], scalar_prefetch = 0 : i64, scratch_operands = 0 : i64, tpu.core_type = #tpu.core_type<tc>} {
    %c0 = arith.constant 0 : index
    %c0_0 = arith.constant 0 : index
    %0 = vector.load %arg0[%c0, %c0_0] : memref<32x8xf32, #tpu.memory_space<vmem>>, vector<32x8xf32>
    %c0_1 = arith.constant 0 : index
    %c0_2 = arith.constant 0 : index
    %1 = vector.load %arg1[%c0_1, %c0_2] : memref<32x32xf32, #tpu.memory_space<vmem>>, vector<32x32xf32>
    %c0_3 = arith.constant 0 : index
    %c0_4 = arith.constant 0 : index
    %c0_5 = arith.constant 0 : index
    %2 = vector.load %arg2[%c0_3, %c0_4, %c0_5] : memref<4x11x8xf32, #tpu.memory_space<vmem>>, vector<4x11x8xf32>
    %3 = vector.extract_strided_slice %2 {offsets = [0, 0, 0], sizes = [4, 8, 8], strides = [1, 1, 1]} : vector<4x11x8xf32> to vector<4x8x8xf32>
    %4 = vector.extract_strided_slice %2 {offsets = [0, 8, 0], sizes = [4, 1, 8], strides = [1, 1, 1]} : vector<4x11x8xf32> to vector<4x1x8xf32>
    %5 = vector.extract_strided_slice %2 {offsets = [0, 9, 0], sizes = [4, 1, 8], strides = [1, 1, 1]} : vector<4x11x8xf32> to vector<4x1x8xf32>
    %6 = vector.extract_strided_slice %2 {offsets = [0, 10, 0], sizes = [4, 1, 8], strides = [1, 1, 1]} : vector<4x11x8xf32> to vector<4x1x8xf32>
    %c0_6 = arith.constant 0 : index
    %c0_7 = arith.constant 0 : index
    %7 = vector.load %arg3[%c0_6, %c0_7] : memref<35x4xf32, #tpu.memory_space<vmem>>, vector<35x4xf32>
    %8 = vector.extract_strided_slice %7 {offsets = [0, 0], sizes = [32, 4], strides = [1, 1]} : vector<35x4xf32> to vector<32x4xf32>
    %9 = vector.extract_strided_slice %7 {offsets = [32, 0], sizes = [1, 4], strides = [1, 1]} : vector<35x4xf32> to vector<1x4xf32>
    %10 = vector.extract_strided_slice %7 {offsets = [33, 0], sizes = [1, 4], strides = [1, 1]} : vector<35x4xf32> to vector<1x4xf32>
    %11 = vector.extract_strided_slice %7 {offsets = [34, 0], sizes = [1, 4], strides = [1, 1]} : vector<35x4xf32> to vector<1x4xf32>
    %12 = arith.truncf %0 : vector<32x8xf32> to vector<32x8xbf16>
    %13 = vector.shape_cast %12 : vector<32x8xbf16> to vector<1x32x8xbf16>
    %14 = vector.shape_cast %13 : vector<1x32x8xbf16> to vector<1x32x8xbf16>
    %15 = vector.broadcast %14 : vector<1x32x8xbf16> to vector<4x32x8xbf16>
    %16 = arith.truncf %3 : vector<4x8x8xf32> to vector<4x8x8xbf16>
    "tpu.trace_start"() <{level = 10 : i32, message = "hnf,hfd->hnd"}> : () -> ()
    %cst = arith.constant dense<0.000000e+00> : vector<4x32x8xf32>
    %17 = tpu.matmul %15, %16, %cst {dimension_numbers = #tpu.dot_dimension_numbers<[2], [1], [1], [2], [0, 0, 0, 1, 1, 2], [0], [0]>} : vector<4x32x8xbf16>, vector<4x8x8xbf16>, vector<4x32x8xf32> -> vector<4x32x8xf32>
    "tpu.trace_stop"() : () -> ()
    %18 = vector.broadcast %4 : vector<4x1x8xf32> to vector<4x32x8xf32>
    %19 = arith.mulf %17, %18 : vector<4x32x8xf32>
    %cst_8 = arith.constant dense<0.000000e+00> : vector<4x32xf32>
    %20 = vector.multi_reduction <add>, %19, %cst_8 [2] : vector<4x32x8xf32> to vector<4x32xf32>
    %21 = vector.broadcast %5 : vector<4x1x8xf32> to vector<4x32x8xf32>
    %22 = arith.mulf %17, %21 : vector<4x32x8xf32>
    %cst_9 = arith.constant dense<0.000000e+00> : vector<4x32xf32>
    %23 = vector.multi_reduction <add>, %22, %cst_9 [2] : vector<4x32x8xf32> to vector<4x32xf32>
    %24 = vector.shape_cast %23 : vector<4x32xf32> to vector<4x32x1xf32>
    %25 = vector.shape_cast %20 : vector<4x32xf32> to vector<4x1x32xf32>
    %26 = vector.broadcast %24 : vector<4x32x1xf32> to vector<4x32x32xf32>
    %27 = vector.broadcast %25 : vector<4x1x32xf32> to vector<4x32x32xf32>
    %28 = arith.addf %26, %27 : vector<4x32x32xf32>
    %cst_10 = arith.constant 2.000000e-01 : f32
    %29 = vector.broadcast %cst_10 : f32 to vector<4x32x32xf32>
    %30 = arith.mulf %29, %28 : vector<4x32x32xf32>
    %31 = arith.maximumf %28, %30 : vector<4x32x32xf32>
    %32 = vector.shape_cast %1 : vector<32x32xf32> to vector<1x32x32xf32>
    %33 = vector.broadcast %32 : vector<1x32x32xf32> to vector<4x32x32xf32>
    %34 = arith.addf %31, %33 : vector<4x32x32xf32>
    %cst_11 = arith.constant dense<0xFF800000> : vector<4x32xf32>
    %35 = vector.multi_reduction <maximumf>, %34, %cst_11 [2] : vector<4x32x32xf32> to vector<4x32xf32>
    %36 = vector.shape_cast %35 : vector<4x32xf32> to vector<4x32x1xf32>
    %37 = vector.broadcast %36 : vector<4x32x1xf32> to vector<4x32x32xf32>
    %38 = arith.subf %34, %37 : vector<4x32x32xf32>
    %39 = math.exp %38 : vector<4x32x32xf32>
    %cst_12 = arith.constant dense<0.000000e+00> : vector<4x32xf32>
    %40 = vector.multi_reduction <add>, %39, %cst_12 [2] : vector<4x32x32xf32> to vector<4x32xf32>
    %41 = vector.shape_cast %40 : vector<4x32xf32> to vector<4x32x1xf32>
    %42 = arith.truncf %39 : vector<4x32x32xf32> to vector<4x32x32xbf16>
    %43 = arith.truncf %17 : vector<4x32x8xf32> to vector<4x32x8xbf16>
    "tpu.trace_start"() <{level = 10 : i32, message = "hij,hjf->hif"}> : () -> ()
    %cst_13 = arith.constant dense<0.000000e+00> : vector<4x32x8xf32>
    %44 = tpu.matmul %42, %43, %cst_13 {dimension_numbers = #tpu.dot_dimension_numbers<[2], [1], [1], [2], [0, 0, 0, 1, 1, 2], [0], [0]>} : vector<4x32x32xbf16>, vector<4x32x8xbf16>, vector<4x32x8xf32> -> vector<4x32x8xf32>
    "tpu.trace_stop"() : () -> ()
    %45 = vector.broadcast %41 : vector<4x32x1xf32> to vector<4x32x8xf32>
    %46 = arith.divf %44, %45 : vector<4x32x8xf32>
    %47 = vector.broadcast %6 : vector<4x1x8xf32> to vector<4x32x8xf32>
    %48 = arith.addf %46, %47 : vector<4x32x8xf32>
    %cst_14 = arith.constant 0.000000e+00 : f32
    %49 = vector.broadcast %cst_14 : f32 to vector<4x32x8xf32>
    %50 = arith.cmpf ogt, %48, %49 : vector<4x32x8xf32>
    %cst_15 = arith.constant 0.000000e+00 : f32
    %51 = vector.broadcast %cst_15 : f32 to vector<4x32x8xf32>
    %52 = arith.minimumf %48, %51 : vector<4x32x8xf32>
    %53 = math.exp %52 : vector<4x32x8xf32>
    %cst_16 = arith.constant 1.000000e+00 : f32
    %54 = vector.broadcast %cst_16 : f32 to vector<4x32x8xf32>
    %55 = arith.subf %53, %54 : vector<4x32x8xf32>
    %56 = arith.select %50, %48, %55 : vector<4x32x8xi1>, vector<4x32x8xf32>
    %cst_17 = arith.constant 0.000000e+00 : f32
    %57 = vector.broadcast %cst_17 : f32 to vector<32x4xf32>
    %58 = vector.extract_strided_slice %56 {offsets = [0, 0, 0], sizes = [1, 32, 8], strides = [1, 1, 1]} : vector<4x32x8xf32> to vector<1x32x8xf32>
    %59 = vector.shape_cast %58 : vector<1x32x8xf32> to vector<32x8xf32>
    %60 = arith.truncf %59 : vector<32x8xf32> to vector<32x8xbf16>
    %61 = vector.extract_strided_slice %8 {offsets = [0, 0], sizes = [8, 4], strides = [1, 1]} : vector<32x4xf32> to vector<8x4xf32>
    %62 = arith.truncf %61 : vector<8x4xf32> to vector<8x4xbf16>
    %cst_18 = arith.constant dense<0.000000e+00> : vector<32x4xf32>
    %63 = tpu.matmul %60, %62, %cst_18 {dimension_numbers = #tpu.dot_dimension_numbers<[1], [0], [0], [1], [0, 0, 1, 1], [], []>} : vector<32x8xbf16>, vector<8x4xbf16>, vector<32x4xf32> -> vector<32x4xf32>
    %64 = arith.addf %57, %63 : vector<32x4xf32>
    %65 = vector.extract_strided_slice %56 {offsets = [1, 0, 0], sizes = [1, 32, 8], strides = [1, 1, 1]} : vector<4x32x8xf32> to vector<1x32x8xf32>
    %66 = vector.shape_cast %65 : vector<1x32x8xf32> to vector<32x8xf32>
    %67 = arith.truncf %66 : vector<32x8xf32> to vector<32x8xbf16>
    %68 = vector.extract_strided_slice %8 {offsets = [8, 0], sizes = [8, 4], strides = [1, 1]} : vector<32x4xf32> to vector<8x4xf32>
    %69 = arith.truncf %68 : vector<8x4xf32> to vector<8x4xbf16>
    %cst_19 = arith.constant dense<0.000000e+00> : vector<32x4xf32>
    %70 = tpu.matmul %67, %69, %cst_19 {dimension_numbers = #tpu.dot_dimension_numbers<[1], [0], [0], [1], [0, 0, 1, 1], [], []>} : vector<32x8xbf16>, vector<8x4xbf16>, vector<32x4xf32> -> vector<32x4xf32>
    %71 = arith.addf %64, %70 : vector<32x4xf32>
    %72 = vector.extract_strided_slice %56 {offsets = [2, 0, 0], sizes = [1, 32, 8], strides = [1, 1, 1]} : vector<4x32x8xf32> to vector<1x32x8xf32>
    %73 = vector.shape_cast %72 : vector<1x32x8xf32> to vector<32x8xf32>
    %74 = arith.truncf %73 : vector<32x8xf32> to vector<32x8xbf16>
    %75 = vector.extract_strided_slice %8 {offsets = [16, 0], sizes = [8, 4], strides = [1, 1]} : vector<32x4xf32> to vector<8x4xf32>
    %76 = arith.truncf %75 : vector<8x4xf32> to vector<8x4xbf16>
    %cst_20 = arith.constant dense<0.000000e+00> : vector<32x4xf32>
    %77 = tpu.matmul %74, %76, %cst_20 {dimension_numbers = #tpu.dot_dimension_numbers<[1], [0], [0], [1], [0, 0, 1, 1], [], []>} : vector<32x8xbf16>, vector<8x4xbf16>, vector<32x4xf32> -> vector<32x4xf32>
    %78 = arith.addf %71, %77 : vector<32x4xf32>
    %79 = vector.extract_strided_slice %56 {offsets = [3, 0, 0], sizes = [1, 32, 8], strides = [1, 1, 1]} : vector<4x32x8xf32> to vector<1x32x8xf32>
    %80 = vector.shape_cast %79 : vector<1x32x8xf32> to vector<32x8xf32>
    %81 = arith.truncf %80 : vector<32x8xf32> to vector<32x8xbf16>
    %82 = vector.extract_strided_slice %8 {offsets = [24, 0], sizes = [8, 4], strides = [1, 1]} : vector<32x4xf32> to vector<8x4xf32>
    %83 = arith.truncf %82 : vector<8x4xf32> to vector<8x4xbf16>
    %cst_21 = arith.constant dense<0.000000e+00> : vector<32x4xf32>
    %84 = tpu.matmul %81, %83, %cst_21 {dimension_numbers = #tpu.dot_dimension_numbers<[1], [0], [0], [1], [0, 0, 1, 1], [], []>} : vector<32x8xbf16>, vector<8x4xbf16>, vector<32x4xf32> -> vector<32x4xf32>
    %85 = arith.addf %78, %84 : vector<32x4xf32>
    %86 = vector.shape_cast %85 : vector<32x4xf32> to vector<1x32x4xf32>
    %87 = vector.shape_cast %9 : vector<1x4xf32> to vector<1x1x4xf32>
    %88 = vector.shape_cast %10 : vector<1x4xf32> to vector<1x1x4xf32>
    %89 = vector.broadcast %87 : vector<1x1x4xf32> to vector<1x32x4xf32>
    %90 = arith.mulf %86, %89 : vector<1x32x4xf32>
    %cst_22 = arith.constant dense<0.000000e+00> : vector<1x32xf32>
    %91 = vector.multi_reduction <add>, %90, %cst_22 [2] : vector<1x32x4xf32> to vector<1x32xf32>
    %92 = vector.broadcast %88 : vector<1x1x4xf32> to vector<1x32x4xf32>
    %93 = arith.mulf %86, %92 : vector<1x32x4xf32>
    %cst_23 = arith.constant dense<0.000000e+00> : vector<1x32xf32>
    %94 = vector.multi_reduction <add>, %93, %cst_23 [2] : vector<1x32x4xf32> to vector<1x32xf32>
    %95 = vector.shape_cast %94 : vector<1x32xf32> to vector<1x32x1xf32>
    %96 = vector.shape_cast %91 : vector<1x32xf32> to vector<1x1x32xf32>
    %97 = vector.broadcast %95 : vector<1x32x1xf32> to vector<1x32x32xf32>
    %98 = vector.broadcast %96 : vector<1x1x32xf32> to vector<1x32x32xf32>
    %99 = arith.addf %97, %98 : vector<1x32x32xf32>
    %cst_24 = arith.constant 2.000000e-01 : f32
    %100 = vector.broadcast %cst_24 : f32 to vector<1x32x32xf32>
    %101 = arith.mulf %100, %99 : vector<1x32x32xf32>
    %102 = arith.maximumf %99, %101 : vector<1x32x32xf32>
    %103 = vector.shape_cast %1 : vector<32x32xf32> to vector<1x32x32xf32>
    %104 = arith.addf %102, %103 : vector<1x32x32xf32>
    %cst_25 = arith.constant dense<0xFF800000> : vector<1x32xf32>
    %105 = vector.multi_reduction <maximumf>, %104, %cst_25 [2] : vector<1x32x32xf32> to vector<1x32xf32>
    %106 = vector.shape_cast %105 : vector<1x32xf32> to vector<1x32x1xf32>
    %107 = vector.broadcast %106 : vector<1x32x1xf32> to vector<1x32x32xf32>
    %108 = arith.subf %104, %107 : vector<1x32x32xf32>
    %109 = math.exp %108 : vector<1x32x32xf32>
    %cst_26 = arith.constant dense<0.000000e+00> : vector<1x32xf32>
    %110 = vector.multi_reduction <add>, %109, %cst_26 [2] : vector<1x32x32xf32> to vector<1x32xf32>
    %111 = vector.shape_cast %110 : vector<1x32xf32> to vector<1x32x1xf32>
    %112 = arith.truncf %109 : vector<1x32x32xf32> to vector<1x32x32xbf16>
    %113 = arith.truncf %86 : vector<1x32x4xf32> to vector<1x32x4xbf16>
    "tpu.trace_start"() <{level = 10 : i32, message = "hij,hjf->hif"}> : () -> ()
    %cst_27 = arith.constant dense<0.000000e+00> : vector<1x32x4xf32>
    %114 = tpu.matmul %112, %113, %cst_27 {dimension_numbers = #tpu.dot_dimension_numbers<[2], [1], [1], [2], [0, 0, 0, 1, 1, 2], [0], [0]>} : vector<1x32x32xbf16>, vector<1x32x4xbf16>, vector<1x32x4xf32> -> vector<1x32x4xf32>
    "tpu.trace_stop"() : () -> ()
    %115 = vector.broadcast %111 : vector<1x32x1xf32> to vector<1x32x4xf32>
    %116 = arith.divf %114, %115 : vector<1x32x4xf32>
    %117 = vector.shape_cast %116 : vector<1x32x4xf32> to vector<32x4xf32>
    %118 = vector.broadcast %11 : vector<1x4xf32> to vector<32x4xf32>
    %119 = arith.addf %117, %118 : vector<32x4xf32>
    %cst_28 = arith.constant dense<0xFF800000> : vector<32xf32>
    %120 = vector.multi_reduction <maximumf>, %119, %cst_28 [1] : vector<32x4xf32> to vector<32xf32>
    %121 = vector.shape_cast %120 : vector<32xf32> to vector<32x1xf32>
    %122 = vector.broadcast %121 : vector<32x1xf32> to vector<32x4xf32>
    %123 = arith.subf %119, %122 : vector<32x4xf32>
    %124 = math.exp %123 : vector<32x4xf32>
    %cst_29 = arith.constant dense<0.000000e+00> : vector<32xf32>
    %125 = vector.multi_reduction <add>, %124, %cst_29 [1] : vector<32x4xf32> to vector<32xf32>
    %126 = vector.shape_cast %125 : vector<32xf32> to vector<32x1xf32>
    %127 = math.log %126 : vector<32x1xf32>
    %128 = vector.broadcast %127 : vector<32x1xf32> to vector<32x4xf32>
    %129 = arith.subf %123, %128 : vector<32x4xf32>
    %c0_30 = arith.constant 0 : index
    %c0_31 = arith.constant 0 : index
    %130 = vector.load %arg4[%c0_30, %c0_31] : memref<32x4xf32, #tpu.memory_space<vmem>>, vector<32x4xf32>
    tpu.vector_store %arg4[%c0_30, %c0_31], %129 {strides = array<i32>} : memref<32x4xf32, #tpu.memory_space<vmem>>, vector<32x4xf32>,
    return
  }
}

</mosaic_0001>

<bundles_post_ra>
// kernel: tpu_custom_call.1
= control target key start
LH: loop header
LB: loop body
LE: loop exit
PB: predicated region body
PF: predicated region fallthrough
CT: control target
= control target key end

     0   :  { %vm52_vm0 = vcmask 1043456   ;;  %vm45_vm1 = vcmask 64512   ;;  %v261_v18 = vlaneseq  ;;  %vm455_vm2 = vcmask 195712   ;;  %s2575_s2 = inlined_call_operand.vmem [shape: f32[4,11,8], index: 2, kind: input, shape index: {}]   ;;  %s2576_s0 = inlined_call_operand.vmem [shape: f32[32,8], index: 0, kind: input, shape index: {}]   ;;  %s2577_s1 = inlined_call_operand.vmem [shape: f32[32,32], index: 1, kind: input, shape index: {}]   ;;  %s2578_s3 = inlined_call_operand.vmem [shape: f32[35,4], index: 3, kind: input, shape index: {}]   ;;  %s2579_s4 = inlined_call_operand.vmem [shape: f32[32,4], index: 4, kind: output, shape index: {}]  }
   0x1   :  { %v26_v0 = vld [vmem:[%s2575_s2] sm:$0xff]  ;;  %v19_v2 = vld [vmem:[%s2576_s0 + $0x8] sm:$0xff]  ;;  %v20_v5 = vld [vmem:[%s2576_s0 + $0x10] sm:$0xff]  ;;  %vm448_vm3 = vcmask 130112   ;;  %vm462_vm4 = vcmask 261312   ;;  %vm619_vm5 = vcmask 261120  }
   0x2   :  { %v18_v1 = vld [vmem:[%s2576_s0] sm:$0xff]  ;;  %v41_v3 = vpack.c.bf16 %v26_v0, %v26_v0  ;;  %v21_v6 = vld [vmem:[%s2576_s0 + $0x18] sm:$0xff]  ;;  %v28_v7 = vld [vmem:[%s2575_s2 + $0x10] sm:$0xff]  ;;  %v2059_v19 = vshrl.u32 %v261_v18, 7 }
   0x3   :  { %v39_v4 = vpack.c.bf16 %v19_v2, %v18_v1  ;;  %v42_v8 = vpack.c.bf16 %v28_v7, %v28_v7  ;;  %v30_v9 = vld [vmem:[%s2575_s2 + $0x20] sm:$0xff]  ;;  %v32_v10 = vld [vmem:[%s2575_s2 + $0x30] sm:$0xff]  ;;  %v40_v12 = vpack.c.bf16 %v21_v6, %v20_v5  ;;  %v2067_v21 = vld [vmem:[%s2575_s2 + $0x8] sm:$0x7] }
   0x4   :  { %1852 = vmatprep.subr.msk.bf16.mxu1 %vm52_vm0, %v41_v3  ;;  %v54_v11 = vsel %vm52_vm0, %v41_v3, 0  ;;  %v43_v13 = vpack.c.bf16 %v30_v9, %v30_v9  ;;  %v44_v16 = vpack.c.bf16 %v32_v10, %v32_v10  ;;  %v2062_v20 = vsub.s32 0, %v2059_v19  ;;  %v2084_v27 = vld [vmem:[%s2575_s2 + $0x18] sm:$0x7] }
   0x5   :  { %1754 = vmatprep.mubr.msk.bf16.mxu1 %vm45_vm1, %v39_v4  ;;  %1753 = vmatpush3.bf16.msra.mxu1 %v54_v11  ;;  %v106_v14 = vsel %vm52_vm0, %v42_v8, 0  ;;  %v2093_v31 = vsub.s32 1, %v2059_v19 }
   0x6   :  { %1766 = vmatprep.mubr.msk.bf16.mxu0 %vm45_vm1, %v39_v4  ;;  %1853 = vmatprep.subr.msk.bf16.mxu1 %vm52_vm0, %v42_v8  ;;  %v158_v15 = vsel %vm52_vm0, %v43_v13, 0  ;;  %v210_v17 = vsel %vm52_vm0, %v44_v16, 0  ;;  %v2071_v22 = vrot.slane %v2067_v21, %v2062_v20  ;;  %v268_v38 = vrot.slane %v2084_v27, %v2062_v20 }
   0x7   :  { %1854 = vmatprep.subr.msk.bf16.mxu0 %vm52_vm0, %v43_v13  ;;  %v348_v37 = vrot.slane %v2084_v27, %v2093_v31  ;;  %v344_v5 = vrot.slane %v2067_v21, %v2093_v31 }
   0x8   :  { %1765 = vmatpush3.bf16.msra.mxu0 %v158_v15  ;;  %1755 = vmatmul.mubr.msk.bf16.vlgmr.msra.gmra.mrb[0].mxu1 %vm45_vm1, %v40_v12 }
   0x9   :  { %1759 = vmatpush3.bf16.msra.mxu1 %v106_v14  ;;  %1760 = vmatprep.mubr.msk.bf16.mxu1 %vm45_vm1, %v39_v4  ;;  %v2158_v14 = vld [vmem:[%s2575_s2 + $0x28] sm:$0x7] }
   0xa   :  { %1855 = vmatprep.subr.msk.bf16.mxu1 %vm52_vm0, %v44_v16  ;;  %v272_v15 = vrot.slane %v2158_v14, %v2062_v20 }
   0xb   :  { %1767 = vmatmul.mubr.msk.bf16.vlgmr.msra.gmra.mrb[0].mxu0 %vm45_vm1, %v40_v12 }
  0x10   :  { %1761 = vmatmul.mubr.msk.bf16.vlgmr.msra.gmra.mrb[4].mxu1 %vm45_vm1, %v40_v12 }
  0x11   :  { %1771 = vmatpush3.bf16.msra.mxu1 %v210_v17  ;;  %1772 = vmatprep.mubr.msk.bf16.mxu1 %vm45_vm1, %v39_v4 }
  0x18   :  { %1773 = vmatmul.mubr.msk.bf16.vlgmr.msra.gmra.mrb[8].mxu1 %vm45_vm1, %v40_v12 }
  0xdb   :  { %v2073_v23 = vpop.f32.mrb[0].mxu1 }
  0xdc   :  { %v2075_v24 = vpop.f32.mrb[1].mxu1  ;;  %v279_v9 = vmul.f32 %v2073_v23, %v2071_v22 }
  0xdd   :  { %v2077_v25 = vpop.f32.mrb[2].mxu1  ;;  %v277_v26 = vmul.f32 %v2071_v22, %v2075_v24  ;;  %v357_v13 = vmul.f32 %v344_v5, %v2075_v24 }
  0xde   :  { %v2086_v28 = vpop.f32.mrb[0].mxu0  ;;  %v773_v29 = vpack.c.bf16 %v2077_v25, %v2073_v23  ;;  %v2090_v30 = vpop.f32.mrb[3].mxu1  ;;  %v280_v61 = vmul.f32 %v2077_v25, %v2071_v22  ;;  %v299_v11 = vsel %vm45_vm1, %v279_v9, 0.0 }
  0xdf   :  { %v2095_v32 = vpop.f32.mrb[1].mxu0  ;;  %v772_v33 = vpack.c.bf16 %v2090_v30, %v2075_v24  ;;  %v293_v34 = vsel %vm45_vm1, %v277_v26, 0.0  ;;  %v278_v35 = vmul.f32 %v2071_v22, %v2090_v30  ;;  %v358_v12 = vmul.f32 %v344_v5, %v2090_v30 }
  0xe0   :  { %v2102_v36 = vpop.f32.mrb[2].mxu0  ;;  %294 = vadd.xlane.f32.xlu0 %v293_v34  ;;  %v302_v6 = vsel %vm45_vm1, %v280_v61, 0.0  ;;  %v373_v17 = vsel %vm45_vm1, %v357_v13, 0.0  ;;  %v360_v22 = vmul.f32 %v2077_v25, %v344_v5  ;;  %v359_v26 = vmul.f32 %v2073_v23, %v344_v5 }
  0xe1   :  { %v2110_v39 = vpack.c.bf16 %v2102_v36, %v2086_v28  ;;  %v2112_v40 = vpop.f32.mrb[3].mxu0  ;;  %1776 = vmatprep.subr.bf16.mxu0 %v772_v33  ;;  %v296_v41 = vsel %vm45_vm1, %v278_v35, 0.0  ;;  %v376_v16 = vsel %vm45_vm1, %v358_v12, 0.0  ;;  %v352_v34 = vrot.slane %v2158_v14, %v2093_v31 }
  0xe2   :  { %v2117_v42 = vpack.c.bf16 %v2112_v40, %v2095_v32  ;;  %1777 = vmatpush3.bf16.msra.mxu0 %v772_v33  ;;  %297 = vadd.xlane.f32.xlu1 %v296_v41  ;;  %v382_v24 = vsel %vm45_vm1, %v360_v22, 0.0  ;;  %v286_v30 = vmul.f32 %v272_v15, %v2112_v40  ;;  %v285_v33 = vmul.f32 %v272_v15, %v2095_v32 }
  0xe3   :  { %v1762_v43 = vpop.f32.mrb[4].mxu1  ;;  %1778 = vmatprep.subr.bf16.mxu0 %v773_v29  ;;  %v288_v23 = vmul.f32 %v2102_v36, %v272_v15 }
  0xe4   :  { %v142_v44 = vpop.f32.mrb[5].mxu1  ;;  %v363_v45 = vmul.f32 %v1762_v43, %v348_v37  ;;  %v283_v46 = vmul.f32 %v1762_v43, %v268_v38  ;;  %v320_v35 = vsel %vm45_vm1, %v286_v30, 0.0  ;;  %v317_v25 = vsel %vm45_vm1, %v285_v33, 0.0 }
  0xe5   :  { %v1763_v47 = vpop.f32.mrb[6].mxu1  ;;  %v281_v48 = vmul.f32 %v268_v38, %v142_v44  ;;  %v361_v57 = vmul.f32 %v348_v37, %v142_v44 }
  0xe6   :  { %v775_v49 = vpack.c.bf16 %v1763_v47, %v1762_v43  ;;  %v145_v50 = vpop.f32.mrb[7].mxu1  ;;  %1779 = vmatpush3.bf16.msra.mxu0 %v773_v29  ;;  %v391_v51 = vsel %vm45_vm1, %v363_v45, 0.0  ;;  %v311_v52 = vsel %vm45_vm1, %v283_v46, 0.0  ;;  %v284_v53 = vmul.f32 %v1763_v47, %v268_v38  ;;  %v33_v45 = vld [vmem:[%s2575_s2 + $0x38] sm:$0x7] }
  0xe7   :  { %v774_v54 = vpack.c.bf16 %v145_v50, %v142_v44  ;;  %392 = vadd.xlane.f32.xlu0 %v391_v51  ;;  %312 = vadd.xlane.f32.xlu1 %v311_v52  ;;  %v305_v55 = vsel %vm45_vm1, %v281_v48, 0.0  ;;  %v364_v58 = vmul.f32 %v1763_v47, %v348_v37  ;;  %v385_v63 = vsel %vm45_vm1, %v361_v57, 0.0 }
  0xe8   :  { %1792 = vmatprep.subr.bf16.mxu0 %v2117_v42  ;;  %v314_v56 = vsel %vm45_vm1, %v284_v53, 0.0  ;;  %v282_v1 = vmul.f32 %v268_v38, %v145_v50  ;;  %v362_v8 = vmul.f32 %v348_v37, %v145_v50  ;;  %v379_v29 = vsel %vm45_vm1, %v359_v26, 0.0 }
  0xe9   :  { %1784 = vmatprep.subr.bf16.mxu1 %v774_v54  ;;  %v394_v0 = vsel %vm45_vm1, %v364_v58, 0.0  ;;  %v287_v37 = vmul.f32 %v2086_v28, %v272_v15  ;;  %v326_v38 = vsel %vm45_vm1, %v288_v23, 0.0  ;;  %v366_v43 = vmul.f32 %v352_v34, %v2112_v40 }
  0xea   :  { %1785 = vmatpush3.bf16.msra.mxu1 %v774_v54  ;;  %v308_v7 = vsel %vm45_vm1, %v282_v1, 0.0  ;;  %v388_v10 = vsel %vm45_vm1, %v362_v8, 0.0  ;;  %v365_v44 = vmul.f32 %v352_v34, %v2095_v32  ;;  %v276_v46 = vrot.slane %v33_v45, %v2062_v20 }
  0xeb   :  { %306 = vadd.xlane.f32.xlu0 %v305_v55  ;;  %315 = vadd.xlane.f32.xlu1 %v314_v56  ;;  %v2124_v59 = vpop.f32.mrb[8].mxu1  ;;  %v323_v41 = vsel %vm45_vm1, %v287_v37, 0.0  ;;  %v400_v47 = vsel %vm45_vm1, %v366_v43, 0.0  ;;  %v367_v50 = vmul.f32 %v2086_v28, %v352_v34  ;;  %v356_v53 = vrot.slane %v33_v45, %v2093_v31 }
  0xec   :  { %1786 = vmatprep.subr.bf16.mxu1 %v775_v49  ;;  %v2126_v60 = vpop.f32.mrb[9].mxu1  ;;  %v397_v48 = vsel %vm45_vm1, %v365_v44, 0.0  ;;  %v291_v51 = vmul.f32 %v2124_v59, %v276_v46 }
  0xed   :  { %v2130_v62 = vpop.f32.mrb[10].mxu1  ;;  %v403_v40 = vsel %vm45_vm1, %v367_v50, 0.0  ;;  %v289_v28 = vmul.f32 %v276_v46, %v2126_v60  ;;  %v369_v58 = vmul.f32 %v356_v53, %v2126_v60  ;;  %v371_v1 = vmul.f32 %v2124_v59, %v356_v53 }
  0xee   :  { %1787 = vmatpush3.bf16.msra.mxu1 %v775_v49  ;;  %v2136_v2 = vpack.c.bf16 %v2130_v62, %v2124_v59  ;;  %v2138_v3 = vpop.f32.mrb[11].mxu1  ;;  %v368_v49 = vmul.f32 %v2102_v36, %v352_v34  ;;  %v292_v52 = vmul.f32 %v2130_v62, %v276_v46  ;;  %v335_v54 = vsel %vm45_vm1, %v291_v51, 0.0 }
  0xef   :  { %386 = vadd.xlane.f32.xlu0 %v385_v63  ;;  %395 = vadd.xlane.f32.xlu1 %v394_v0  ;;  %v2142_v4 = vpack.c.bf16 %v2138_v3, %v2126_v60  ;;  %v290_v55 = vmul.f32 %v276_v46, %v2138_v3  ;;  %v329_v56 = vsel %vm45_vm1, %v289_v28, 0.0  ;;  %v370_v61 = vmul.f32 %v356_v53, %v2138_v3 }
  0xf0   :  { %v406_v32 = vsel %vm45_vm1, %v368_v49, 0.0  ;;  %v338_v36 = vsel %vm45_vm1, %v292_v52, 0.0  ;;  %v409_v63 = vsel %vm45_vm1, %v369_v58, 0.0  ;;  %v372_v5 = vmul.f32 %v2130_v62, %v356_v53  ;;  %v2242_v58 = vld [vmem:[%s2577_s1 + $0x8] sm:$0xff] }
  0xf1   :  { %1800 = vmatprep.subr.bf16.mxu1 %v2142_v4  ;;  %v332_v57 = vsel %vm45_vm1, %v290_v55, 0.0  ;;  %v412_v0 = vsel %vm45_vm1, %v370_v61, 0.0  ;;  %v2247_v61 = vld [vmem:[%s2577_s1 + $0x10] sm:$0xff] }
  0xf3   :  { %303 = vadd.xlane.f32.xlu1 %v302_v6  ;;  %309 = vadd.xlane.f32.xlu0 %v308_v7  ;;  %v415_v6 = vsel %vm45_vm1, %v371_v1, 0.0  ;;  %v418_v7 = vsel %vm45_vm1, %v372_v5, 0.0 }
  0xf7   :  { %389 = vadd.xlane.f32.xlu1 %v388_v10  ;;  %300 = vadd.xlane.f32.xlu0 %v299_v11  ;;  %v438_v10 = vand.u32 127, %v261_v18 }
  0xf9   :  { %v443_v13 = vadd.s32 4294967288, %v438_v10  ;;  %v450_v59 = vadd.s32 4294967280, %v438_v10  ;;  %v457_v15 = vadd.s32 4294967272, %v438_v10  ;;  %v2215_v26 = vsub.s32 %v438_v10, %v2059_v19 }
  0xfb   :  { %377 = vadd.xlane.f32.xlu1 %v376_v16  ;;  %374 = vadd.xlane.f32.xlu0 %v373_v17  ;;  %v2209_v17 = vsub.s32 %v443_v13, %v2059_v19  ;;  %v2212_v22 = vsub.s32 %v450_v59, %v2059_v19 }
  0xff   :  { %383 = vadd.xlane.f32.xlu1 %v382_v24  ;;  %380 = vadd.xlane.f32.xlu0 %v379_v29  ;;  %v2218_v24 = vsub.s32 %v457_v15, %v2059_v19 }
 0x103   :  { %321 = vadd.xlane.f32.xlu1 %v320_v35  ;;  %318 = vadd.xlane.f32.xlu0 %v317_v25 }
 0x107   :  { %327 = vadd.xlane.f32.xlu1 %v326_v38  ;;  %324 = vadd.xlane.f32.xlu0 %v323_v41 }
 0x10b   :  { %401 = vadd.xlane.f32.xlu1 %v400_v47  ;;  %398 = vadd.xlane.f32.xlu0 %v397_v48 }
 0x10f   :  { %407 = vadd.xlane.f32.xlu1 %v406_v32  ;;  %404 = vadd.xlane.f32.xlu0 %v403_v40 }
 0x113   :  { %336 = vadd.xlane.f32.xlu0 %v335_v54  ;;  %339 = vadd.xlane.f32.xlu1 %v338_v36 }
 0x117   :  { %330 = vadd.xlane.f32.xlu0 %v329_v56  ;;  %333 = vadd.xlane.f32.xlu1 %v332_v57  ;;  %v2237_v57 = vld [vmem:[%s2577_s1] sm:$0xff] }
 0x11b   :  { %410 = vadd.xlane.f32.xlu0 %v409_v63  ;;  %413 = vadd.xlane.f32.xlu1 %v412_v0 }
 0x11f   :  { %416 = vadd.xlane.f32.xlu0 %v415_v6  ;;  %419 = vadd.xlane.f32.xlu1 %v418_v7 }
 0x16d   :  { %v295_v3 = vpop.xlane.xlu0 %294 }
 0x16e   :  { %v442_v25 = vrot.slane %v295_v3, %v2215_v26 }
 0x16f   :  { %v298_v60 = vpop.xlane.xlu1 %297 }
 0x170   :  { %v447_v30 = vrot.slane %v298_v60, %v2209_v17  ;;  %v2252_v60 = vld [vmem:[%s2577_s1 + $0x18] sm:$0xff] }
 0x172   :  { %v449_v44 = vsel %vm448_vm3, %v447_v30, %v442_v25 }
 0x174   :  { %v393_v8 = vpop.xlane.xlu0 %392  ;;  %v313_v9 = vpop.xlane.xlu1 %312 }
 0x175   :  { %v476_v35 = vrot.slane %v313_v9, %v2212_v22 }
 0x178   :  { %v307_v11 = vpop.xlane.xlu0 %306  ;;  %v316_v12 = vpop.xlane.xlu1 %315 }
 0x179   :  { %v467_v33 = vrot.slane %v307_v11, %v2215_v26  ;;  %v481_v23 = vrot.slane %v316_v12, %v2218_v24 }
 0x17c   :  { %v387_v62 = vpop.xlane.xlu0 %386  ;;  %v396_v16 = vpop.xlane.xlu1 %395 }
 0x180   :  { %v304_v18 = vpop.xlane.xlu1 %303  ;;  %v310_v29 = vpop.xlane.xlu0 %309 }
 0x181   :  { %v471_v34 = vrot.slane %v310_v29, %v2209_v17  ;;  %v461_v45 = vrot.slane %v304_v18, %v2218_v24 }
 0x183   :  { %v472_v37 = vsel %vm448_vm3, %v471_v34, %v467_v33 }
 0x184   :  { %v390_v38 = vpop.xlane.xlu1 %389  ;;  %v477_v41 = vsel %vm455_vm2, %v476_v35, %v472_v37  ;;  %v301_v43 = vpop.xlane.xlu0 %300 }
 0x185   :  { %v482_v46 = vsel %vm462_vm4, %v481_v23, %v477_v41  ;;  %v454_v47 = vrot.slane %v301_v43, %v2212_v22 }
 0x186   :  { %v560_v48 = vadd.f32 %v482_v46, %v390_v38  ;;  %v559_v49 = vadd.f32 %v482_v46, %v387_v62  ;;  %v561_v50 = vadd.f32 %v482_v46, %v393_v8  ;;  %v562_v32 = vadd.f32 %v482_v46, %v396_v16 }
 0x187   :  { %v456_v40 = vsel %vm455_vm2, %v454_v47, %v449_v44 }
 0x188   :  { %v576_v51 = vmul.f32 0.2, %v560_v48  ;;  %v378_v52 = vpop.xlane.xlu1 %377  ;;  %v463_v53 = vsel %vm462_vm4, %v461_v45, %v456_v40  ;;  %v375_v54 = vpop.xlane.xlu0 %374  ;;  %v575_v36 = vmul.f32 0.2, %v559_v49  ;;  %v577_v28 = vmul.f32 0.2, %v561_v50 }
 0x189   :  { %v556_v55 = vadd.f32 %v463_v53, %v378_v52  ;;  %v555_v56 = vadd.f32 %v463_v53, %v375_v54  ;;  %v578_v63 = vmul.f32 0.2, %v562_v32 }
 0x18a   :  { %v592_v0 = vmax.f32 %v560_v48, %v576_v51  ;;  %v591_v1 = vmax.f32 %v559_v49, %v575_v36  ;;  %v593_v5 = vmax.f32 %v561_v50, %v577_v28 }
 0x18b   :  { %v572_v6 = vmul.f32 0.2, %v556_v55  ;;  %v571_v7 = vmul.f32 0.2, %v555_v56  ;;  %v594_v3 = vmax.f32 %v562_v32, %v578_v63 }
 0x18c   :  { %v384_v8 = vpop.xlane.xlu1 %383  ;;  %v381_v9 = vpop.xlane.xlu0 %380  ;;  %v2255_v10 = vadd.f32 %v591_v1, %v2237_v57  ;;  %v2258_v11 = vadd.f32 %v592_v0, %v2242_v58  ;;  %v2261_v12 = vadd.f32 %v593_v5, %v2247_v61 }
 0x18d   :  { %v588_v13 = vmax.f32 %v556_v55, %v572_v6  ;;  %v587_v59 = vmax.f32 %v555_v56, %v571_v7  ;;  %v558_v15 = vadd.f32 %v463_v53, %v384_v8  ;;  %v557_v62 = vadd.f32 %v463_v53, %v381_v9 }
 0x18e   :  { %v632_v16 = vsel %vm619_vm5, %v2255_v10, -inf  ;;  %v635_v18 = vsel %vm619_vm5, %v2258_v11, -inf  ;;  %v2268_v29 = vadd.f32 %v594_v3, %v2252_v60  ;;  %v638_v25 = vsel %vm619_vm5, %v2261_v12, -inf }
 0x18f   :  { %v574_v30 = vmul.f32 0.2, %v558_v15  ;;  %v573_v33 = vmul.f32 0.2, %v557_v62  ;;  %633 = vmax.xlane.f32.xlu0 %v632_v16  ;;  %636 = vmax.xlane.f32.xlu1 %v635_v18  ;;  %v2275_v37 = vadd.f32 %v587_v59, %v2237_v57  ;;  %v2278_v38 = vadd.f32 %v588_v13, %v2242_v58 }
 0x190   :  { %v322_v34 = vpop.xlane.xlu1 %321  ;;  %v319_v35 = vpop.xlane.xlu0 %318  ;;  %v641_v23 = vsel %vm619_vm5, %v2268_v29, -inf }
 0x191   :  { %v590_v41 = vmax.f32 %v558_v15, %v574_v30  ;;  %v589_v43 = vmax.f32 %v557_v62, %v573_v33  ;;  %v490_v44 = vrot.slane %v322_v34, %v2209_v17  ;;  %v486_v45 = vrot.slane %v319_v35, %v2215_v26 }
 0x192   :  { %v620_v50 = vsel %vm619_vm5, %v2275_v37, -inf  ;;  %v623_v40 = vsel %vm619_vm5, %v2278_v38, -inf }
 0x193   :  { %639 = vmax.xlane.f32.xlu0 %v638_v25  ;;  %642 = vmax.xlane.f32.xlu1 %v641_v23  ;;  %v491_v32 = vsel %vm448_vm3, %v490_v44, %v486_v45  ;;  %v2290_v51 = vadd.f32 %v589_v43, %v2247_v61  ;;  %v2293_v52 = vadd.f32 %v590_v41, %v2252_v60 }
 0x194   :  { %v328_v46 = vpop.xlane.xlu1 %327  ;;  %v325_v47 = vpop.xlane.xlu0 %324 }
 0x195   :  { %v500_v48 = vrot.slane %v328_v46, %v2218_v24  ;;  %v495_v49 = vrot.slane %v325_v47, %v2212_v22  ;;  %v626_v63 = vsel %vm619_vm5, %v2290_v51, -inf  ;;  %v629_v0 = vsel %vm619_vm5, %v2293_v52, -inf }
 0x197   :  { %v496_v53 = vsel %vm455_vm2, %v495_v49, %v491_v32  ;;  %621 = vmax.xlane.f32.xlu0 %v620_v50  ;;  %624 = vmax.xlane.f32.xlu1 %v623_v40 }
 0x198   :  { %v402_v54 = vpop.xlane.xlu1 %401  ;;  %v501_v36 = vsel %vm462_vm4, %v500_v48, %v496_v53  ;;  %v399_v28 = vpop.xlane.xlu0 %398 }
 0x199   :  { %v564_v55 = vadd.f32 %v501_v36, %v402_v54  ;;  %v563_v56 = vadd.f32 %v501_v36, %v399_v28 }
 0x19b   :  { %v580_v1 = vmul.f32 0.2, %v564_v55  ;;  %v579_v5 = vmul.f32 0.2, %v563_v56  ;;  %627 = vmax.xlane.f32.xlu0 %v626_v63  ;;  %630 = vmax.xlane.f32.xlu1 %v629_v0 }
 0x19c   :  { %v408_v6 = vpop.xlane.xlu1 %407  ;;  %v405_v7 = vpop.xlane.xlu0 %404 }
 0x19d   :  { %v596_v3 = vmax.f32 %v564_v55, %v580_v1  ;;  %v595_v8 = vmax.f32 %v563_v56, %v579_v5  ;;  %v566_v9 = vadd.f32 %v501_v36, %v408_v6  ;;  %v565_v13 = vadd.f32 %v501_v36, %v405_v7 }
 0x19f   :  { %v582_v59 = vmul.f32 0.2, %v566_v9  ;;  %v581_v15 = vmul.f32 0.2, %v565_v13  ;;  %v2302_v62 = vadd.f32 %v595_v8, %v2237_v57  ;;  %v2305_v16 = vadd.f32 %v596_v3, %v2242_v58 }
 0x1a0   :  { %v337_v18 = vpop.xlane.xlu0 %336  ;;  %v340_v30 = vpop.xlane.xlu1 %339 }
 0x1a1   :  { %v598_v33 = vmax.f32 %v566_v9, %v582_v59  ;;  %v597_v34 = vmax.f32 %v565_v13, %v581_v15  ;;  %v644_v35 = vsel %vm619_vm5, %v2302_v62, -inf  ;;  %v647_v25 = vsel %vm619_vm5, %v2305_v16, -inf }
 0x1a2   :  { %645 = vmax.xlane.f32.xlu0 %v644_v35  ;;  %648 = vmax.xlane.f32.xlu1 %v647_v25  ;;  %v514_v49 = vrot.slane %v337_v18, %v2212_v22  ;;  %v519_v50 = vrot.slane %v340_v30, %v2218_v24 }
 0x1a3   :  { %v2312_v23 = vadd.f32 %v597_v34, %v2247_v61  ;;  %v2315_v41 = vadd.f32 %v598_v33, %v2252_v60 }
 0x1a4   :  { %v331_v43 = vpop.xlane.xlu0 %330  ;;  %v334_v44 = vpop.xlane.xlu1 %333 }
 0x1a5   :  { %v505_v45 = vrot.slane %v331_v43, %v2215_v26  ;;  %v509_v46 = vrot.slane %v334_v44, %v2209_v17  ;;  %v650_v47 = vsel %vm619_vm5, %v2312_v23, -inf  ;;  %v653_v48 = vsel %vm619_vm5, %v2315_v41, -inf }
 0x1a6   :  { %651 = vmax.xlane.f32.xlu0 %v650_v47  ;;  %654 = vmax.xlane.f32.xlu1 %v653_v48 }
 0x1a7   :  { %v510_v32 = vsel %vm448_vm3, %v509_v46, %v505_v45 }
 0x1a8   :  { %v411_v40 = vpop.xlane.xlu0 %410  ;;  %v515_v53 = vsel %vm455_vm2, %v514_v49, %v510_v32  ;;  %v414_v54 = vpop.xlane.xlu1 %413 }
 0x1a9   :  { %v520_v36 = vsel %vm462_vm4, %v519_v50, %v515_v53 }
 0x1aa   :  { %v567_v28 = vadd.f32 %v520_v36, %v411_v40  ;;  %v568_v55 = vadd.f32 %v520_v36, %v414_v54 }
 0x1ac   :  { %v583_v56 = vmul.f32 0.2, %v567_v28  ;;  %v584_v63 = vmul.f32 0.2, %v568_v55  ;;  %v417_v0 = vpop.xlane.xlu0 %416  ;;  %v420_v1 = vpop.xlane.xlu1 %419 }
 0x1ad   :  { %v569_v5 = vadd.f32 %v520_v36, %v417_v0  ;;  %v570_v6 = vadd.f32 %v520_v36, %v420_v1 }
 0x1ae   :  { %v599_v7 = vmax.f32 %v567_v28, %v583_v56  ;;  %v600_v3 = vmax.f32 %v568_v55, %v584_v63 }
 0x1af   :  { %v585_v8 = vmul.f32 0.2, %v569_v5  ;;  %v586_v9 = vmul.f32 0.2, %v570_v6 }
 0x1b0   :  { %v2329_v13 = vadd.f32 %v599_v7, %v2237_v57  ;;  %v2332_v59 = vadd.f32 %v600_v3, %v2242_v58 }
 0x1b1   :  { %v601_v15 = vmax.f32 %v569_v5, %v585_v8  ;;  %v602_v18 = vmax.f32 %v570_v6, %v586_v9 }
 0x1b2   :  { %v656_v30 = vsel %vm619_vm5, %v2329_v13, -inf  ;;  %v659_v33 = vsel %vm619_vm5, %v2332_v59, -inf }
 0x1b3   :  { %657 = vmax.xlane.f32.xlu0 %v656_v30  ;;  %660 = vmax.xlane.f32.xlu1 %v659_v33  ;;  %v2339_v34 = vadd.f32 %v601_v15, %v2247_v61  ;;  %v2342_v35 = vadd.f32 %v602_v18, %v2252_v60 }
 0x1b5   :  { %v662_v57 = vsel %vm619_vm5, %v2339_v34, -inf  ;;  %v665_v58 = vsel %vm619_vm5, %v2342_v35, -inf }
 0x1b7   :  { %663 = vmax.xlane.f32.xlu0 %v662_v57  ;;  %666 = vmax.xlane.f32.xlu1 %v665_v58 }
 0x21c   :  { %v634_v25 = vpop.xlane.xlu0 %633  ;;  %v637_v43 = vpop.xlane.xlu1 %636 }
 0x21d   :  { %v672_v44 = vsub.f32 %v2255_v10, %v634_v25  ;;  %v673_v45 = vsub.f32 %v2258_v11, %v637_v43 }
 0x21f   :  { %v692_v46 = vmul.f32 1.442695, %v672_v44  ;;  %v694_v61 = vmul.f32 1.442695, %v673_v45 }
 0x220   :  { %v640_v47 = vpop.xlane.xlu0 %639  ;;  %v643_v48 = vpop.xlane.xlu1 %642 }
 0x221   :  { %1860 = vpow2.f32 %v692_v46  ;;  %v674_v60 = vsub.f32 %v2261_v12, %v640_v47  ;;  %v675_v49 = vsub.f32 %v2268_v29, %v643_v48 }
 0x222   :  { %1862 = vpow2.f32 %v694_v61 }
 0x223   :  { %v696_v50 = vmul.f32 1.442695, %v674_v60  ;;  %v698_v32 = vmul.f32 1.442695, %v675_v49 }
 0x224   :  { %v622_v40 = vpop.xlane.xlu0 %621  ;;  %v625_v53 = vpop.xlane.xlu1 %624 }
 0x225   :  { %1864 = vpow2.f32 %v696_v50  ;;  %v668_v54 = vsub.f32 %v2275_v37, %v622_v40  ;;  %v669_v10 = vsub.f32 %v2278_v38, %v625_v53 }
 0x226   :  { %1866 = vpow2.f32 %v698_v32 }
 0x227   :  { %v684_v11 = vmul.f32 1.442695, %v668_v54  ;;  %v686_v36 = vmul.f32 1.442695, %v669_v10 }
 0x228   :  { %v628_v28 = vpop.xlane.xlu0 %627  ;;  %v631_v55 = vpop.xlane.xlu1 %630 }
 0x229   :  { %1868 = vpow2.f32 %v684_v11  ;;  %v670_v12 = vsub.f32 %v2290_v51, %v628_v28  ;;  %v671_v29 = vsub.f32 %v2293_v52, %v631_v55 }
 0x22a   :  { %1870 = vpow2.f32 %v686_v36 }
 0x22b   :  { %v1861_v56 = vpop.eup %1860  ;;  %v688_v63 = vmul.f32 1.442695, %v670_v12  ;;  %v690_v0 = vmul.f32 1.442695, %v671_v29 }
 0x22c   :  { %v1863_v1 = vpop.eup %1862  ;;  %v728_v5 = vsel %vm619_vm5, %v1861_v56, 0.0 }
 0x22d   :  { %1872 = vpow2.f32 %v688_v63  ;;  %729 = vadd.xlane.f32.xlu0 %v728_v5  ;;  %v731_v37 = vsel %vm619_vm5, %v1863_v1, 0.0  ;;  %v766_v38 = vpack.c.bf16 %v1863_v1, %v1861_v56 }
 0x22e   :  { %1874 = vpow2.f32 %v690_v0  ;;  %732 = vadd.xlane.f32.xlu1 %v731_v37 }
 0x22f   :  { %v1865_v6 = vpop.eup %1864  ;;  %1788 = vmatprep.mubr.msk.bf16.mxu1 %vm619_vm5, %v766_v38  ;;  %v646_v7 = vpop.xlane.xlu0 %645 }
 0x230   :  { %v1867_v51 = vpop.eup %1866  ;;  %v649_v52 = vpop.xlane.xlu1 %648  ;;  %v734_v3 = vsel %vm619_vm5, %v1865_v6, 0.0  ;;  %v676_v8 = vsub.f32 %v2302_v62, %v646_v7 }
 0x231   :  { %v677_v9 = vsub.f32 %v2305_v16, %v649_v52  ;;  %735 = vadd.xlane.f32.xlu0 %v734_v3  ;;  %v737_v15 = vsel %vm619_vm5, %v1867_v51, 0.0  ;;  %v767_v18 = vpack.c.bf16 %v1867_v51, %v1865_v6 }
 0x232   :  { %738 = vadd.xlane.f32.xlu1 %v737_v15  ;;  %v700_v33 = vmul.f32 1.442695, %v676_v8  ;;  %v35_v8 = vld [vmem:[%s2578_s3 + $0x8] sm:$0xff] }
 0x233   :  { %v1869_v30 = vpop.eup %1868  ;;  %v702_v57 = vmul.f32 1.442695, %v677_v9  ;;  %1789 = vmatmul.mubr.msk.bf16.vlgmr.msra.gmra.mrb[12].mxu1 %vm619_vm5, %v767_v18  ;;  %v652_v25 = vpop.xlane.xlu0 %651  ;;  %v1165_v9 = vpack.c.bf16 %v35_v8, %v35_v8  ;;  %v34_v18 = vld [vmem:[%s2578_s3] sm:$0xff] }
 0x234   :  { %v1871_v58 = vpop.eup %1870  ;;  %1801 = vmatpush3.bf16.msra.mxu1 %v2142_v4  ;;  %v655_v43 = vpop.xlane.xlu1 %654  ;;  %v716_v44 = vsel %vm619_vm5, %v1869_v30, 0.0  ;;  %1876 = vpow2.f32 %v700_v33  ;;  %v678_v62 = vsub.f32 %v2312_v23, %v652_v25 }
 0x235   :  { %1802 = vmatprep.subr.bf16.mxu1 %v2136_v2  ;;  %v679_v16 = vsub.f32 %v2315_v41, %v655_v43  ;;  %717 = vadd.xlane.f32.xlu0 %v716_v44  ;;  %v719_v45 = vsel %vm619_vm5, %v1871_v58, 0.0  ;;  %1878 = vpow2.f32 %v702_v57  ;;  %v764_v46 = vpack.c.bf16 %v1871_v58, %v1869_v30 }
 0x236   :  { %720 = vadd.xlane.f32.xlu1 %v719_v45  ;;  %v704_v47 = vmul.f32 1.442695, %v678_v62  ;;  %v1173_v15 = vsel %vm52_vm0, %v1165_v9, 0  ;;  %v2402_v30 = vpack.c.bf16 %v34_v18, %v34_v18 }
 0x237   :  { %v1873_v61 = vpop.eup %1872  ;;  %v706_v4 = vmul.f32 1.442695, %v679_v16  ;;  %1780 = vmatprep.mubr.msk.bf16.mxu0 %vm619_vm5, %v764_v46  ;;  %v2407_v16 = vsub.s32 2, %v2059_v19 }
 0x238   :  { %v1875_v48 = vpop.eup %1874  ;;  %1803 = vmatpush3.bf16.msra.mxu1 %v2136_v2  ;;  %v722_v23 = vsel %vm619_vm5, %v1873_v61, 0.0  ;;  %1880 = vpow2.f32 %v704_v47 }
 0x239   :  { %723 = vadd.xlane.f32.xlu0 %v722_v23  ;;  %v725_v41 = vsel %vm619_vm5, %v1875_v48, 0.0  ;;  %v765_v60 = vpack.c.bf16 %v1875_v48, %v1873_v61  ;;  %1882 = vpow2.f32 %v706_v4  ;;  %v1039_v61 = vrot.slane %v2084_v27, %v2407_v16 }
 0x23a   :  { %726 = vadd.xlane.f32.xlu1 %v725_v41 }
 0x23b   :  { %1781 = vmatmul.mubr.msk.bf16.vlgmr.msra.gmra.mrb[4].mxu0 %vm619_vm5, %v765_v60 }
 0x23c   :  { %1793 = vmatpush3.bf16.msra.mxu0 %v2117_v42 }
 0x23d   :  { %1794 = vmatprep.subr.bf16.mxu0 %v2110_v39 }
 0x23e   :  { %v1877_v49 = vpop.eup %1876 }
 0x23f   :  { %v1879_v50 = vpop.eup %1878  ;;  %v740_v2 = vsel %vm619_vm5, %v1877_v49, 0.0 }
 0x240   :  { %1795 = vmatpush3.bf16.msra.mxu0 %v2110_v39  ;;  %v658_v32 = vpop.xlane.xlu0 %657  ;;  %v661_v40 = vpop.xlane.xlu1 %660  ;;  %741 = vadd.xlane.f32.xlu0 %v740_v2  ;;  %v743_v54 = vsel %vm619_vm5, %v1879_v50, 0.0  ;;  %v768_v11 = vpack.c.bf16 %v1879_v50, %v1877_v49 }
 0x241   :  { %v680_v53 = vsub.f32 %v2329_v13, %v658_v32  ;;  %v681_v10 = vsub.f32 %v2332_v59, %v661_v40  ;;  %744 = vadd.xlane.f32.xlu1 %v743_v54  ;;  %1856 = vmatprep.subr.msk.bf16.mxu0 %vm52_vm0, %v1165_v9 }
 0x242   :  { %v1881_v42 = vpop.eup %1880  ;;  %1796 = vmatprep.mubr.msk.bf16.mxu0 %vm619_vm5, %v768_v11 }
 0x243   :  { %v708_v36 = vmul.f32 1.442695, %v680_v53  ;;  %v710_v28 = vmul.f32 1.442695, %v681_v10  ;;  %v1883_v55 = vpop.eup %1882  ;;  %v746_v39 = vsel %vm619_vm5, %v1881_v42, 0.0 }
 0x244   :  { %v664_v12 = vpop.xlane.xlu0 %663  ;;  %v667_v29 = vpop.xlane.xlu1 %666  ;;  %747 = vadd.xlane.f32.xlu0 %v746_v39  ;;  %v749_v56 = vsel %vm619_vm5, %v1883_v55, 0.0  ;;  %v769_v63 = vpack.c.bf16 %v1883_v55, %v1881_v42 }
 0x245   :  { %1884 = vpow2.f32 %v708_v36  ;;  %v682_v13 = vsub.f32 %v2339_v34, %v664_v12  ;;  %v683_v59 = vsub.f32 %v2342_v35, %v667_v29  ;;  %750 = vadd.xlane.f32.xlu1 %v749_v56  ;;  %v1035_v12 = vrot.slane %v2067_v21, %v2407_v16 }
 0x246   :  { %1886 = vpow2.f32 %v710_v28  ;;  %1797 = vmatmul.mubr.msk.bf16.vlgmr.msra.gmra.mrb[8].mxu0 %vm619_vm5, %v769_v63 }
 0x247   :  { %v712_v0 = vmul.f32 1.442695, %v682_v13  ;;  %v714_v1 = vmul.f32 1.442695, %v683_v59  ;;  %1809 = vmatpush3.bf16.msra.mxu0 %v1173_v15 }
 0x248   :  { %1857 = vmatprep.subr.msk.bf16.mxu0 %vm52_vm0, %v2402_v30 }
 0x249   :  { %1888 = vpow2.f32 %v712_v0 }
 0x24a   :  { %1890 = vpow2.f32 %v714_v1 }
 0x24f   :  { %v1885_v5 = vpop.eup %1884 }
 0x250   :  { %v1887_v37 = vpop.eup %1886  ;;  %v752_v38 = vsel %vm619_vm5, %v1885_v5, 0.0 }
 0x251   :  { %753 = vadd.xlane.f32.xlu0 %v752_v38  ;;  %v755_v34 = vsel %vm619_vm5, %v1887_v37, 0.0  ;;  %v770_v6 = vpack.c.bf16 %v1887_v37, %v1885_v5 }
 0x252   :  { %756 = vadd.xlane.f32.xlu1 %v755_v34 }
 0x253   :  { %v1889_v51 = vpop.eup %1888  ;;  %1804 = vmatprep.mubr.msk.bf16.mxu1 %vm619_vm5, %v770_v6 }
 0x254   :  { %v1891_v35 = vpop.eup %1890  ;;  %v758_v7 = vsel %vm619_vm5, %v1889_v51, 0.0 }
 0x255   :  { %759 = vadd.xlane.f32.xlu0 %v758_v7  ;;  %v761_v52 = vsel %vm619_vm5, %v1891_v35, 0.0  ;;  %v771_v3 = vpack.c.bf16 %v1891_v35, %v1889_v51 }
 0x256   :  { %762 = vadd.xlane.f32.xlu1 %v761_v52 }
 0x257   :  { %1805 = vmatmul.mubr.msk.bf16.vlgmr.msra.gmra.mrb[16].mxu1 %vm619_vm5, %v771_v3 }
 0x2ba   :  { %v730_v33 = vpop.xlane.xlu0 %729 }
 0x2bb   :  { %v733_v57 = vpop.xlane.xlu1 %732 }
 0x2be   :  { %v736_v58 = vpop.xlane.xlu0 %735 }
 0x2bf   :  { %v739_v25 = vpop.xlane.xlu1 %738  ;;  %1892 = vrcp.f32 %v736_v58 }
 0x2c0   :  { %1894 = vrcp.f32 %v730_v33 }
 0x2c1   :  { %1896 = vrcp.f32 %v739_v25 }
 0x2c2   :  { %v718_v43 = vpop.xlane.xlu0 %717  ;;  %1898 = vrcp.f32 %v733_v57 }
 0x2c3   :  { %v721_v44 = vpop.xlane.xlu1 %720 }
 0x2c6   :  { %v724_v62 = vpop.xlane.xlu0 %723 }
 0x2c7   :  { %v727_v45 = vpop.xlane.xlu1 %726  ;;  %1900 = vrcp.f32 %v724_v62 }
 0x2c8   :  { %1902 = vrcp.f32 %v718_v43 }
 0x2c9   :  { %v1893_v47 = vpop.eup %1892  ;;  %1904 = vrcp.f32 %v727_v45 }
 0x2ca   :  { %v1895_v48 = vpop.eup %1894  ;;  %1906 = vrcp.f32 %v721_v44 }
 0x2cb   :  { %v1897_v60 = vpop.eup %1896 }
 0x2cc   :  { %v1899_v2 = vpop.eup %1898 }
 0x2cd   :  { %v742_v46 = vpop.xlane.xlu0 %741 }
 0x2ce   :  { %v745_v53 = vpop.xlane.xlu1 %744  ;;  %1908 = vrcp.f32 %v742_v46 }
 0x2d1   :  { %v748_v27 = vpop.xlane.xlu0 %747  ;;  %v1901_v29 = vpop.eup %1900 }
 0x2d2   :  { %1910 = vrcp.f32 %v748_v27  ;;  %v1903_v63 = vpop.eup %1902  ;;  %v751_v38 = vpop.xlane.xlu1 %750 }
 0x2d3   :  { %v1905_v37 = vpop.eup %1904 }
 0x2d4   :  { %v1907_v35 = vpop.eup %1906 }
 0x2d8   :  { %v1909_v44 = vpop.eup %1908 }
 0x2dc   :  { %v1911_v46 = vpop.eup %1910 }
 0x2de   :  { %v754_v62 = vpop.xlane.xlu0 %753 }
 0x306   :  { %v1790_v4 = vpop.f32.mrb[12].mxu1 }
 0x307   :  { %v1013_v23 = vmul.f32 %v1893_v47, %v1790_v4  ;;  %v875_v41 = vpop.f32.mrb[13].mxu1  ;;  %v757_v4 = vpop.xlane.xlu1 %756 }
 0x308   :  { %v1009_v49 = vmul.f32 %v1895_v48, %v875_v41  ;;  %v1791_v50 = vpop.f32.mrb[14].mxu1  ;;  %v1043_v41 = vrot.slane %v2158_v14, %v2407_v16 }
 0x309   :  { %v2411_v19 = vadd.f32 %v1039_v61, %v1013_v23  ;;  %v1015_v32 = vmul.f32 %v1897_v60, %v1791_v50  ;;  %v878_v40 = vpop.f32.mrb[15].mxu1 }
 0x30a   :  { %v2413_v54 = vadd.f32 %v1039_v61, %v1009_v49  ;;  %v1011_v10 = vmul.f32 %v1899_v2, %v878_v40  ;;  %v1231_v2 = vsel %vm52_vm0, %v2402_v30, 0 }
 0x30b   :  { %v1086_v11 = vmin.f32 %v2411_v19, 0.0  ;;  %v2416_v42 = vadd.f32 %v1039_v61, %v1015_v32  ;;  %vm1070_vm6 = vcmp.gt.f32.partialorder %v2411_v19, 0.0 }
 0x30c   :  { %v1084_v36 = vmin.f32 %v2413_v54, 0.0  ;;  %v2419_v28 = vadd.f32 %v1039_v61, %v1011_v10  ;;  %vm1068_vm7 = vcmp.gt.f32.partialorder %v2413_v54, 0.0 }
 0x30d   :  { %v1108_v55 = vmul.f32 1.442695, %v1086_v11  ;;  %v1087_v39 = vmin.f32 %v2416_v42, 0.0  ;;  %vm1071_vm8 = vcmp.gt.f32.partialorder %v2416_v42, 0.0  ;;  %v760_v11 = vpop.xlane.xlu0 %759 }
 0x30e   :  { %v1104_v13 = vmul.f32 1.442695, %v1084_v36  ;;  %v1085_v56 = vmin.f32 %v2419_v28, 0.0  ;;  %v1782_v59 = vpop.f32.mrb[4].mxu0  ;;  %vm1069_vm9 = vcmp.gt.f32.partialorder %v2419_v28, 0.0 }
 0x30f   :  { %1912 = vpow2.f32 %v1108_v55  ;;  %v1110_v0 = vmul.f32 1.442695, %v1087_v39  ;;  %v1005_v1 = vmul.f32 %v1901_v29, %v1782_v59  ;;  %v820_v5 = vpop.f32.mrb[5].mxu0 }
 0x310   :  { %1914 = vpow2.f32 %v1104_v13  ;;  %v1106_v34 = vmul.f32 1.442695, %v1085_v56  ;;  %v1001_v6 = vmul.f32 %v1903_v63, %v820_v5  ;;  %v1783_v51 = vpop.f32.mrb[6].mxu0  ;;  %v36_v63 = vld [vmem:[%s2578_s3 + $0x10] sm:$0xff] }
 0x311   :  { %1916 = vpow2.f32 %v1110_v0  ;;  %v2425_v21 = vadd.f32 %v1035_v12, %v1005_v1  ;;  %v1007_v7 = vmul.f32 %v1905_v37, %v1783_v51  ;;  %v823_v52 = vpop.f32.mrb[7].mxu0  ;;  %v763_v0 = vpop.xlane.xlu1 %762 }
 0x312   :  { %1918 = vpow2.f32 %v1106_v34  ;;  %v2427_v3 = vadd.f32 %v1035_v12, %v1001_v6  ;;  %v1003_v8 = vmul.f32 %v1907_v35, %v823_v52  ;;  %v1284_v35 = vpack.c.bf16 %v36_v63, %v36_v63 }
 0x313   :  { %1920 = vrcp.f32 %v751_v38  ;;  %v1082_v9 = vmin.f32 %v2425_v21, 0.0  ;;  %v2430_v15 = vadd.f32 %v1035_v12, %v1007_v7  ;;  %vm1066_vm10 = vcmp.gt.f32.partialorder %v2425_v21, 0.0 }
 0x314   :  { %1922 = vrcp.f32 %v745_v53  ;;  %v1080_v18 = vmin.f32 %v2427_v3, 0.0  ;;  %v2433_v33 = vadd.f32 %v1035_v12, %v1003_v8  ;;  %vm1064_vm11 = vcmp.gt.f32.partialorder %v2427_v3, 0.0 }
 0x315   :  { %v1100_v57 = vmul.f32 1.442695, %v1082_v9  ;;  %v1083_v58 = vmin.f32 %v2430_v15, 0.0  ;;  %vm1067_vm12 = vcmp.gt.f32.partialorder %v2430_v15, 0.0 }
 0x316   :  { %v1096_v25 = vmul.f32 1.442695, %v1080_v18  ;;  %v1081_v43 = vmin.f32 %v2433_v33, 0.0  ;;  %vm1065_vm13 = vcmp.gt.f32.partialorder %v2433_v33, 0.0 }
 0x317   :  { %1924 = vpow2.f32 %v1100_v57  ;;  %v1102_v45 = vmul.f32 1.442695, %v1083_v58 }
 0x318   :  { %1926 = vpow2.f32 %v1096_v25  ;;  %v1098_v61 = vmul.f32 1.442695, %v1081_v43 }
 0x319   :  { %v1913_v47 = vpop.eup %1912  ;;  %1928 = vpow2.f32 %v1102_v45  ;;  %v1798_v50 = vpop.f32.mrb[8].mxu0 }
 0x31a   :  { %v1915_v48 = vpop.eup %1914  ;;  %v1688_v23 = vadd.f32 -1.0, %v1913_v47  ;;  %1930 = vpow2.f32 %v1098_v61  ;;  %v1021_v53 = vmul.f32 %v1911_v46, %v1798_v50  ;;  %v930_v10 = vpop.f32.mrb[9].mxu0 }
 0x31b   :  { %v1917_v60 = vpop.eup %1916  ;;  %1932 = vrcp.f32 %v754_v62  ;;  %v1686_v49 = vadd.f32 -1.0, %v1915_v48  ;;  %v1017_v55 = vmul.f32 %v1909_v44, %v930_v10  ;;  %v1799_v39 = vpop.f32.mrb[10].mxu0 }
 0x31c   :  { %v1919_v32 = vpop.eup %1918  ;;  %v1689_v40 = vadd.f32 -1.0, %v1917_v60  ;;  %v1150_v14 = vsel %vm1070_vm6, %v2411_v19, %v1688_v23  ;;  %v2448_v13 = vadd.f32 %v1043_v41, %v1021_v53  ;;  %v933_v59 = vpop.f32.mrb[11].mxu0  ;;  %1934 = vrcp.f32 %v760_v11  ;;  %v1988_v60 = vld [vmem:[%s2575_s2 + $0x38] sm:$0x7] }
 0x31d   :  { %v1921_v27 = vpop.eup %1920  ;;  %v1687_v36 = vadd.f32 -1.0, %v1919_v32  ;;  %v1148_v30 = vsel %vm1068_vm7, %v2413_v54, %v1686_v49  ;;  %v2454_v5 = vadd.f32 %v1043_v41, %v1017_v55  ;;  %1936 = vrcp.f32 %v757_v4 }
 0x31e   :  { %v1923_v12 = vpop.eup %1922  ;;  %v1151_v29 = vsel %vm1071_vm8, %v2416_v42, %v1689_v40  ;;  %v1023_v56 = vmul.f32 %v1921_v27, %v1799_v39  ;;  %v1090_v54 = vmin.f32 %v2448_v13, 0.0  ;;  %1938 = vrcp.f32 %v763_v0 }
 0x31f   :  { %v1164_v19 = vpack.c.bf16 %v1151_v29, %v1150_v14  ;;  %v1149_v1 = vsel %vm1069_vm9, %v2419_v28, %v1687_v36  ;;  %v1019_v37 = vmul.f32 %v1923_v12, %v933_v59  ;;  %v1088_v6 = vmin.f32 %v2454_v5, 0.0 }
 0x320   :  { %v2457_v38 = vadd.f32 %v1043_v41, %v1023_v56  ;;  %v1163_v42 = vpack.c.bf16 %v1149_v1, %v1148_v30  ;;  %v1116_v28 = vmul.f32 1.442695, %v1090_v54  ;;  %v1047_v49 = vrot.slane %v1988_v60, %v2407_v16  ;;  %v2506_v60 = vld [vmem:[%s2578_s3 + $0x20] sm:$0x7] }
 0x321   :  { %v1925_v34 = vpop.eup %1924  ;;  %v2460_v51 = vadd.f32 %v1043_v41, %v1019_v37  ;;  %v1112_v57 = vmul.f32 1.442695, %v1088_v6  ;;  %v1292_v14 = vsel %vm52_vm0, %v1284_v35, 0  ;;  %vm1074_vm14 = vcmp.gt.f32.partialorder %v2448_v13, 0.0 }
 0x322   :  { %v1927_v7 = vpop.eup %1926  ;;  %v1684_v52 = vadd.f32 -1.0, %v1925_v34  ;;  %v1091_v8 = vmin.f32 %v2457_v38, 0.0  ;;  %1810 = vmatprep.mubr.msk.bf16.mxu0 %vm45_vm1, %v1163_v42  ;;  %1940 = vpow2.f32 %v1116_v28  ;;  %vm1072_vm15 = vcmp.gt.f32.partialorder %v2454_v5, 0.0 }
 0x323   :  { %v1929_v9 = vpop.eup %1928  ;;  %v1682_v18 = vadd.f32 -1.0, %v1927_v7  ;;  %v1089_v58 = vmin.f32 %v2460_v51, 0.0  ;;  %1811 = vmatmul.mubr.msk.bf16.vlgmr.msra.gmra.mrb[12].mxu0 %vm45_vm1, %v1164_v19  ;;  %1942 = vpow2.f32 %v1112_v57  ;;  %vm1075_vm6 = vcmp.gt.f32.partialorder %v2457_v38, 0.0 }
 0x324   :  { %v1931_v25 = vpop.eup %1930  ;;  %v1685_v43 = vadd.f32 -1.0, %v1929_v9  ;;  %v1118_v44 = vmul.f32 1.442695, %v1091_v8  ;;  %1815 = vmatpush3.bf16.msra.mxu0 %v1231_v2  ;;  %v1146_v61 = vsel %vm1066_vm10, %v2425_v21, %v1684_v52  ;;  %vm1073_vm7 = vcmp.gt.f32.partialorder %v2460_v51, 0.0 }
 0x325   :  { %v1933_v62 = vpop.eup %1932  ;;  %v1683_v45 = vadd.f32 -1.0, %v1931_v25  ;;  %v1114_v46 = vmul.f32 1.442695, %v1089_v58  ;;  %1858 = vmatprep.subr.msk.bf16.mxu0 %vm52_vm0, %v1284_v35  ;;  %v1144_v4 = vsel %vm1064_vm11, %v2427_v3, %v1682_v18 }
 0x326   :  { %v1147_v47 = vsel %vm1067_vm12, %v2430_v15, %v1685_v43  ;;  %1944 = vpow2.f32 %v1118_v44  ;;  %v1935_v50 = vpop.eup %1934  ;;  %v37_v15 = vld [vmem:[%s2578_s3 + $0x18] sm:$0xff] }
 0x327   :  { %v1161_v48 = vpack.c.bf16 %v1147_v47, %v1146_v61  ;;  %v1145_v23 = vsel %vm1065_vm13, %v2433_v33, %v1683_v45  ;;  %1946 = vpow2.f32 %v1114_v46  ;;  %v1937_v3 = vpop.eup %1936  ;;  %v1349_v36 = vpack.c.bf16 %v37_v15, %v37_v15 }
 0x328   :  { %v1160_v41 = vpack.c.bf16 %v1145_v23, %v1144_v4  ;;  %v1939_v33 = vpop.eup %1938 }
 0x32a   :  { %v1806_v21 = vpop.f32.mrb[16].mxu1  ;;  %1816 = vmatprep.mubr.msk.bf16.mxu0 %vm45_vm1, %v1160_v41 }
 0x32b   :  { %v1029_v2 = vmul.f32 %v1935_v50, %v1806_v21  ;;  %v985_v32 = vpop.f32.mrb[17].mxu1 }
 0x32c   :  { %v1025_v40 = vmul.f32 %v1933_v62, %v985_v32  ;;  %v1807_v53 = vpop.f32.mrb[18].mxu1  ;;  %v1941_v55 = vpop.eup %1940 }
 0x32d   :  { %v1062_v10 = vadd.f32 %v1047_v49, %v1029_v2  ;;  %v1031_v27 = vmul.f32 %v1939_v33, %v1807_v53  ;;  %v988_v11 = vpop.f32.mrb[19].mxu1  ;;  %v1943_v30 = vpop.eup %1942  ;;  %v1692_v29 = vadd.f32 -1.0, %v1941_v55  ;;  %v1436_v2 = vrot.slane %v2506_v60, %v2093_v31 }
 0x32e   :  { %v1060_v39 = vadd.f32 %v1047_v49, %v1025_v40  ;;  %v1027_v12 = vmul.f32 %v1937_v3, %v988_v11  ;;  %v1690_v0 = vadd.f32 -1.0, %v1943_v30 }
 0x32f   :  { %v1094_v56 = vmin.f32 %v1062_v10, 0.0  ;;  %v1063_v59 = vadd.f32 %v1047_v49, %v1031_v27  ;;  %1817 = vmatmul.mubr.msk.bf16.vlgmr.msra.gmra.mrb[12].mxu0 %vm45_vm1, %v1161_v48  ;;  %v1154_v34 = vsel %vm1074_vm14, %v2448_v13, %v1692_v29  ;;  %v1357_v13 = vsel %vm52_vm0, %v1349_v36, 0 }
 0x330   :  { %v1945_v63 = vpop.eup %1944  ;;  %v1092_v19 = vmin.f32 %v1060_v39, 0.0  ;;  %v1061_v1 = vadd.f32 %v1047_v49, %v1027_v12  ;;  %1821 = vmatpush3.bf16.msra.mxu0 %v1292_v14  ;;  %v1152_v52 = vsel %vm1072_vm15, %v2454_v5, %v1690_v0  ;;  %vm1078_vm8 = vcmp.gt.f32.partialorder %v1062_v10, 0.0 }
 0x331   :  { %v1947_v37 = vpop.eup %1946  ;;  %v1693_v54 = vadd.f32 -1.0, %v1945_v63  ;;  %v1124_v42 = vmul.f32 1.442695, %v1094_v56  ;;  %1859 = vmatprep.subr.msk.bf16.mxu0 %vm52_vm0, %v1349_v36  ;;  %v1095_v7 = vmin.f32 %v1063_v59, 0.0  ;;  %vm1079_vm9 = vcmp.gt.f32.partialorder %v1063_v59, 0.0 }
 0x332   :  { %v1691_v6 = vadd.f32 -1.0, %v1947_v37  ;;  %v1120_v35 = vmul.f32 1.442695, %v1092_v19  ;;  %v1093_v8 = vmin.f32 %v1061_v1, 0.0  ;;  %vm1076_vm10 = vcmp.gt.f32.partialorder %v1060_v39, 0.0 }
 0x333   :  { %v1155_v28 = vsel %vm1075_vm6, %v2457_v38, %v1693_v54  ;;  %1948 = vpow2.f32 %v1124_v42  ;;  %v1126_v57 = vmul.f32 1.442695, %v1095_v7  ;;  %vm1077_vm11 = vcmp.gt.f32.partialorder %v1061_v1, 0.0 }
 0x334   :  { %v1283_v9 = vpack.c.bf16 %v1155_v28, %v1154_v34  ;;  %v1153_v18 = vsel %vm1073_vm7, %v2460_v51, %v1691_v6  ;;  %1950 = vpow2.f32 %v1120_v35  ;;  %v1122_v58 = vmul.f32 1.442695, %v1093_v8 }
 0x335   :  { %v1282_v25 = vpack.c.bf16 %v1153_v18, %v1152_v52  ;;  %1952 = vpow2.f32 %v1126_v57  ;;  %v1415_v49 = vrot.slane %v2506_v60, %v2062_v20  ;;  %vm1420_vm0 = vcmask 31744  }
 0x336   :  { %1954 = vpow2.f32 %v1122_v58 }
 0x337   :  { %1822 = vmatprep.mubr.msk.bf16.mxu0 %vm45_vm1, %v1282_v25 }
 0x33b   :  { %1823 = vmatmul.mubr.msk.bf16.vlgmr.msra.gmra.mrb[12].mxu0 %vm45_vm1, %v1283_v9 }
 0x33c   :  { %1827 = vmatpush3.bf16.msra.mxu0 %v1357_v13 }
 0x33d   :  { %v1949_v5 = vpop.eup %1948 }
 0x33e   :  { %v1951_v38 = vpop.eup %1950  ;;  %v1696_v43 = vadd.f32 -1.0, %v1949_v5 }
 0x33f   :  { %v1953_v44 = vpop.eup %1952  ;;  %v1694_v62 = vadd.f32 -1.0, %v1951_v38 }
 0x340   :  { %v1955_v45 = vpop.eup %1954  ;;  %v1697_v51 = vadd.f32 -1.0, %v1953_v44  ;;  %v1158_v61 = vsel %vm1078_vm8, %v1062_v10, %v1696_v43  ;;  %v1989_v43 = vld [vmem:[%s2577_s1] sm:$0xff] }
 0x341   :  { %v1695_v46 = vadd.f32 -1.0, %v1955_v45  ;;  %v1156_v4 = vsel %vm1076_vm10, %v1060_v39, %v1694_v62  ;;  %v1990_v62 = vld [vmem:[%s2577_s1 + $0x8] sm:$0xff] }
 0x342   :  { %v1159_v47 = vsel %vm1079_vm9, %v1063_v59, %v1697_v51 }
 0x343   :  { %v1348_v48 = vpack.c.bf16 %v1159_v47, %v1158_v61  ;;  %v1157_v23 = vsel %vm1077_vm11, %v1061_v1, %v1695_v46  ;;  %v1991_v47 = vld [vmem:[%s2577_s1 + $0x10] sm:$0xff] }
 0x344   :  { %v1347_v41 = vpack.c.bf16 %v1157_v23, %v1156_v4 }
 0x346   :  { %1828 = vmatprep.mubr.msk.bf16.mxu0 %vm45_vm1, %v1347_v41 }
 0x347   :  { %1829 = vmatmul.mubr.msk.bf16.vlgmr.msra.gmra.mrb[12].mxu0 %vm45_vm1, %v1348_v48  ;;  %v1992_v48 = vld [vmem:[%s2577_s1 + $0x18] sm:$0xff] }
 0x41a   :  { %v1830_v50 = vpop.f32.mrb[12].mxu0 }
 0x41b   :  { %v1393_v21 = vpop.f32.mrb[13].mxu0  ;;  %v1418_v15 = vmul.f32 %v1830_v50, %v1415_v49  ;;  %v1439_v12 = vmul.f32 %v1830_v50, %v1436_v2 }
 0x41c   :  { %v1831_v3 = vpop.f32.mrb[14].mxu0  ;;  %v1416_v10 = vmul.f32 %v1415_v49, %v1393_v21  ;;  %v1437_v36 = vmul.f32 %v1436_v2, %v1393_v21 }
 0x41d   :  { %v1538_v32 = vpack.c.bf16 %v1831_v3, %v1830_v50  ;;  %v1396_v33 = vpop.f32.mrb[15].mxu0  ;;  %v1427_v40 = vsel %vm1420_vm0, %v1418_v15, 0.0  ;;  %v1419_v53 = vmul.f32 %v1831_v3, %v1415_v49  ;;  %v1440_v29 = vmul.f32 %v1831_v3, %v1436_v2 }
 0x41e   :  { %v1537_v27 = vpack.c.bf16 %v1396_v33, %v1393_v21  ;;  %1428 = vadd.xlane.f32.xlu0 %v1427_v40  ;;  %v1417_v11 = vmul.f32 %v1415_v49, %v1396_v33  ;;  %v1421_v20 = vsel %vm1420_vm0, %v1416_v10, 0.0  ;;  %v1438_v31 = vmul.f32 %v1436_v2, %v1396_v33 }
 0x41f   :  { %v1430_v14 = vsel %vm1420_vm0, %v1419_v53, 0.0  ;;  %v1441_v39 = vsel %vm1420_vm0, %v1437_v36, 0.0  ;;  %v1447_v56 = vsel %vm1420_vm0, %v1439_v12, 0.0  ;;  %v1450_v59 = vsel %vm1420_vm0, %v1440_v29, 0.0 }
 0x420   :  { %1431 = vadd.xlane.f32.xlu1 %v1430_v14  ;;  %1832 = vmatprep.subr.bf16.mxu1 %v1537_v27  ;;  %v1424_v55 = vsel %vm1420_vm0, %v1417_v11, 0.0  ;;  %v1444_v30 = vsel %vm1420_vm0, %v1438_v31, 0.0 }
 0x421   :  { %1833 = vmatpush3.bf16.msra.mxu1 %v1537_v27 }
 0x422   :  { %1422 = vadd.xlane.f32.xlu0 %v1421_v20  ;;  %1834 = vmatprep.subr.bf16.mxu1 %v1538_v32 }
 0x424   :  { %1425 = vadd.xlane.f32.xlu1 %v1424_v55 }
 0x425   :  { %1835 = vmatpush3.bf16.msra.mxu1 %v1538_v32 }
 0x426   :  { %1442 = vadd.xlane.f32.xlu0 %v1441_v39 }
 0x428   :  { %1445 = vadd.xlane.f32.xlu1 %v1444_v30 }
 0x42a   :  { %1448 = vadd.xlane.f32.xlu0 %v1447_v56 }
 0x42c   :  { %1451 = vadd.xlane.f32.xlu1 %v1450_v59 }
 0x4ab   :  { %v1429_v63 = vpop.xlane.xlu0 %1428 }
 0x4ac   :  { %v1469_v42 = vrot.slane %v1429_v63, %v2212_v22 }
 0x4ad   :  { %v1432_v0 = vpop.xlane.xlu1 %1431 }
 0x4ae   :  { %v1474_v6 = vrot.slane %v1432_v0, %v2218_v24 }
 0x4af   :  { %v1423_v19 = vpop.xlane.xlu0 %1422 }
 0x4b0   :  { %v1460_v37 = vrot.slane %v1423_v19, %v2215_v26 }
 0x4b1   :  { %v1426_v1 = vpop.xlane.xlu1 %1425 }
 0x4b2   :  { %v1464_v54 = vrot.slane %v1426_v1, %v2209_v17 }
 0x4b3   :  { %v1443_v34 = vpop.xlane.xlu0 %1442 }
 0x4b4   :  { %v1465_v35 = vsel %vm448_vm3, %v1464_v54, %v1460_v37  ;;  %v1605_v54 = vrot.slane %v2506_v60, %v2407_v16 }
 0x4b5   :  { %v1470_v7 = vsel %vm455_vm2, %v1469_v42, %v1465_v35  ;;  %v1446_v52 = vpop.xlane.xlu1 %1445 }
 0x4b6   :  { %v1475_v28 = vsel %vm462_vm4, %v1474_v6, %v1470_v7 }
 0x4b7   :  { %v1483_v8 = vadd.f32 %v1475_v28, %v1443_v34  ;;  %v1484_v9 = vadd.f32 %v1475_v28, %v1446_v52  ;;  %v1449_v18 = vpop.xlane.xlu0 %1448 }
 0x4b8   :  { %v1485_v57 = vadd.f32 %v1475_v28, %v1449_v18 }
 0x4b9   :  { %v1487_v58 = vmul.f32 0.2, %v1483_v8  ;;  %v1488_v26 = vmul.f32 0.2, %v1484_v9  ;;  %v1452_v25 = vpop.xlane.xlu1 %1451 }
 0x4ba   :  { %v1489_v17 = vmul.f32 0.2, %v1485_v57  ;;  %v1486_v13 = vadd.f32 %v1475_v28, %v1452_v25 }
 0x4bb   :  { %v1491_v22 = vmax.f32 %v1483_v8, %v1487_v58  ;;  %v1492_v5 = vmax.f32 %v1484_v9, %v1488_v26 }
 0x4bc   :  { %v1493_v38 = vmax.f32 %v1485_v57, %v1489_v17  ;;  %v1490_v24 = vmul.f32 0.2, %v1486_v13 }
 0x4bd   :  { %v1495_v44 = vadd.f32 %v1989_v43, %v1491_v22  ;;  %v1496_v45 = vadd.f32 %v1990_v62, %v1492_v5 }
 0x4be   :  { %v1494_v51 = vmax.f32 %v1486_v13, %v1490_v24  ;;  %v1497_v4 = vadd.f32 %v1991_v47, %v1493_v38 }
 0x4bf   :  { %v1499_v46 = vsel %vm619_vm5, %v1495_v44, -inf  ;;  %v1502_v61 = vsel %vm619_vm5, %v1496_v45, -inf }
 0x4c0   :  { %1500 = vmax.xlane.f32.xlu0 %v1499_v46  ;;  %1503 = vmax.xlane.f32.xlu1 %v1502_v61  ;;  %v1498_v23 = vadd.f32 %v1992_v48, %v1494_v51  ;;  %v1505_v49 = vsel %vm619_vm5, %v1497_v4, -inf }
 0x4c2   :  { %v1508_v41 = vsel %vm619_vm5, %v1498_v23, -inf }
 0x4c4   :  { %1506 = vmax.xlane.f32.xlu0 %v1505_v49  ;;  %1509 = vmax.xlane.f32.xlu1 %v1508_v41 }
 0x54d   :  { %v1501_v50 = vpop.xlane.xlu0 %1500  ;;  %v1504_v21 = vpop.xlane.xlu1 %1503 }
 0x54e   :  { %v1511_v15 = vsub.f32 %v1495_v44, %v1501_v50  ;;  %v1512_v3 = vsub.f32 %v1496_v45, %v1504_v21 }
 0x550   :  { %v1515_v2 = vmul.f32 1.442695, %v1511_v15  ;;  %v1517_v32 = vmul.f32 1.442695, %v1512_v3 }
 0x551   :  { %v1507_v33 = vpop.xlane.xlu0 %1506  ;;  %v1510_v40 = vpop.xlane.xlu1 %1509 }
 0x552   :  { %1956 = vpow2.f32 %v1515_v2  ;;  %v1513_v53 = vsub.f32 %v1497_v4, %v1507_v33  ;;  %v1514_v10 = vsub.f32 %v1498_v23, %v1510_v40 }
 0x553   :  { %1958 = vpow2.f32 %v1517_v32 }
 0x554   :  { %v1519_v27 = vmul.f32 1.442695, %v1513_v53  ;;  %v1521_v11 = vmul.f32 1.442695, %v1514_v10 }
 0x556   :  { %1960 = vpow2.f32 %v1519_v27 }
 0x557   :  { %1962 = vpow2.f32 %v1521_v11 }
 0x55c   :  { %v1957_v14 = vpop.eup %1956 }
 0x55d   :  { %v1959_v20 = vpop.eup %1958  ;;  %v1523_v36 = vsel %vm619_vm5, %v1957_v14, 0.0 }
 0x55e   :  { %1524 = vadd.xlane.f32.xlu0 %v1523_v36  ;;  %v1526_v31 = vsel %vm619_vm5, %v1959_v20, 0.0  ;;  %v1535_v55 = vpack.c.bf16 %v1959_v20, %v1957_v14 }
 0x55f   :  { %1527 = vadd.xlane.f32.xlu1 %v1526_v31 }
 0x560   :  { %v1961_v39 = vpop.eup %1960  ;;  %1836 = vmatprep.mubr.msk.bf16.mxu1 %vm619_vm5, %v1535_v55 }
 0x561   :  { %v1963_v12 = vpop.eup %1962  ;;  %v1529_v30 = vsel %vm619_vm5, %v1961_v39, 0.0 }
 0x562   :  { %1530 = vadd.xlane.f32.xlu0 %v1529_v30  ;;  %v1532_v29 = vsel %vm619_vm5, %v1963_v12, 0.0  ;;  %v1536_v56 = vpack.c.bf16 %v1963_v12, %v1961_v39 }
 0x563   :  { %1533 = vadd.xlane.f32.xlu1 %v1532_v29 }
 0x564   :  { %1837 = vmatmul.mubr.msk.bf16.vlgmr.msra.gmra.mrb[20].mxu1 %vm619_vm5, %v1536_v56 }
 0x5eb   :  { %v1525_v59 = vpop.xlane.xlu0 %1524 }
 0x5ec   :  { %v1528_v63 = vpop.xlane.xlu1 %1527  ;;  %1964 = vrcp.f32 %v1525_v59 }
 0x5ef   :  { %v1531_v0 = vpop.xlane.xlu0 %1530 }
 0x5f0   :  { %v1534_v19 = vpop.xlane.xlu1 %1533  ;;  %1966 = vrcp.f32 %v1531_v0 }
 0x5f1   :  { %1968 = vrcp.f32 %v1528_v63 }
 0x5f2   :  { %1970 = vrcp.f32 %v1534_v19 }
 0x5f6   :  { %v1965_v1 = vpop.eup %1964 }
 0x5fa   :  { %v1967_v42 = vpop.eup %1966 }
 0x5fb   :  { %v1969_v6 = vpop.eup %1968 }
 0x5fc   :  { %v1971_v28 = vpop.eup %1970 }
 0x637   :  { %v1838_v37 = vpop.f32.mrb[20].mxu1 }
 0x638   :  { %v1579_v34 = vpop.f32.mrb[21].mxu1  ;;  %v1599_v35 = vmul.f32 %v1967_v42, %v1838_v37 }
 0x639   :  { %v1595_v7 = vmul.f32 %v1965_v1, %v1579_v34  ;;  %v1839_v52 = vpop.f32.mrb[22].mxu1 }
 0x63a   :  { %v1582_v8 = vpop.f32.mrb[23].mxu1  ;;  %v1601_v9 = vmul.f32 %v1971_v28, %v1839_v52  ;;  %v1608_v25 = vadd.f32 %v1605_v54, %v1599_v35 }
 0x63b   :  { %v1597_v18 = vmul.f32 %v1969_v6, %v1582_v8  ;;  %v1606_v57 = vadd.f32 %v1605_v54, %v1595_v7 }
 0x63c   :  { %v1609_v13 = vadd.f32 %v1605_v54, %v1601_v9  ;;  %v1616_v16 = vsel %vm1420_vm0, %v1608_v25, -inf }
 0x63d   :  { %v1610_v58 = vsel %vm1420_vm0, %v1606_v57, -inf  ;;  %v1607_v26 = vadd.f32 %v1605_v54, %v1597_v18 }
 0x63e   :  { %1611 = vmax.xlane.f32.xlu0 %v1610_v58  ;;  %v1619_v60 = vsel %vm1420_vm0, %v1609_v13, -inf }
 0x63f   :  { %v1613_v17 = vsel %vm1420_vm0, %v1607_v26, -inf }
 0x640   :  { %1614 = vmax.xlane.f32.xlu1 %v1613_v17 }
 0x642   :  { %1617 = vmax.xlane.f32.xlu0 %v1616_v16 }
 0x644   :  { %1620 = vmax.xlane.f32.xlu1 %v1619_v60 }
 0x6cb   :  { %v1612_v22 = vpop.xlane.xlu0 %1611 }
 0x6cc   :  { %v1622_v5 = vsub.f32 %v1606_v57, %v1612_v22 }
 0x6cd   :  { %v1615_v38 = vpop.xlane.xlu1 %1614 }
 0x6ce   :  { %v1626_v24 = vmul.f32 1.442695, %v1622_v5  ;;  %v1623_v43 = vsub.f32 %v1607_v26, %v1615_v38 }
 0x6cf   :  { %v1618_v44 = vpop.xlane.xlu0 %1617 }
 0x6d0   :  { %1972 = vpow2.f32 %v1626_v24  ;;  %v1628_v62 = vmul.f32 1.442695, %v1623_v43  ;;  %v1624_v45 = vsub.f32 %v1608_v25, %v1618_v44 }
 0x6d1   :  { %v1621_v51 = vpop.xlane.xlu1 %1620 }
 0x6d2   :  { %1974 = vpow2.f32 %v1628_v62  ;;  %v1630_v46 = vmul.f32 1.442695, %v1624_v45  ;;  %v1625_v61 = vsub.f32 %v1609_v13, %v1621_v51 }
 0x6d4   :  { %1976 = vpow2.f32 %v1630_v46  ;;  %v1632_v47 = vmul.f32 1.442695, %v1625_v61 }
 0x6d6   :  { %1978 = vpow2.f32 %v1632_v47 }
 0x6da   :  { %v1973_v4 = vpop.eup %1972 }
 0x6db   :  { %v1634_v48 = vsel %vm1420_vm0, %v1973_v4, 0.0 }
 0x6dc   :  { %v1975_v23 = vpop.eup %1974  ;;  %1635 = vadd.xlane.f32.xlu0 %v1634_v48 }
 0x6dd   :  { %v1637_v41 = vsel %vm1420_vm0, %v1975_v23, 0.0 }
 0x6de   :  { %v1977_v49 = vpop.eup %1976  ;;  %1638 = vadd.xlane.f32.xlu1 %v1637_v41 }
 0x6df   :  { %v1640_v50 = vsel %vm1420_vm0, %v1977_v49, 0.0 }
 0x6e0   :  { %v1979_v21 = vpop.eup %1978  ;;  %1641 = vadd.xlane.f32.xlu0 %v1640_v50 }
 0x6e1   :  { %v1643_v15 = vsel %vm1420_vm0, %v1979_v21, 0.0 }
 0x6e2   :  { %1644 = vadd.xlane.f32.xlu1 %v1643_v15 }
 0x769   :  { %v1636_v3 = vpop.xlane.xlu0 %1635 }
 0x76a   :  { %1980 = vlog2.f32 %v1636_v3 }
 0x76b   :  { %v1639_v2 = vpop.xlane.xlu1 %1638 }
 0x76c   :  { %1982 = vlog2.f32 %v1639_v2 }
 0x76d   :  { %v1642_v32 = vpop.xlane.xlu0 %1641 }
 0x76e   :  { %1984 = vlog2.f32 %v1642_v32 }
 0x76f   :  { %v1645_v33 = vpop.xlane.xlu1 %1644 }
 0x770   :  { %1986 = vlog2.f32 %v1645_v33 }
 0x774   :  { %v1981_v40 = vpop.eup %1980 }
 0x775   :  { %v1647_v53 = vmul.f32 0.6931472, %v1981_v40 }
 0x776   :  { %v1983_v10 = vpop.eup %1982 }
 0x777   :  { %v1654_v27 = vsub.f32 %v1622_v5, %v1647_v53  ;;  %v1649_v11 = vmul.f32 0.6931472, %v1983_v10 }
 0x778   :  { %v1985_v14 = vpop.eup %1984 }
 0x779   :  { %1658 = vst.msk [vmem:[%s2579_s4] sm:$0xff] %vm1420_vm0, %v1654_v27  ;;  %v1655_v20 = vsub.f32 %v1623_v43, %v1649_v11  ;;  %v1651_v36 = vmul.f32 0.6931472, %v1985_v14 }
 0x77a   :  { %v1987_v31 = vpop.eup %1986 }
 0x77b   :  { %1659 = vst.msk [vmem:[%s2579_s4 + $0x8] sm:$0xff] %vm1420_vm0, %v1655_v20  ;;  %v1656_v55 = vsub.f32 %v1624_v45, %v1651_v36  ;;  %v1653_v39 = vmul.f32 0.6931472, %v1987_v31 }
 0x77d   :  { %1660 = vst.msk [vmem:[%s2579_s4 + $0x10] sm:$0xff] %vm1420_vm0, %v1656_v55  ;;  %v1657_v12 = vsub.f32 %v1625_v61, %v1653_v39 }
 0x77f   :  { %1661 = vst.msk [vmem:[%s2579_s4 + $0x18] sm:$0xff] %vm1420_vm0, %v1657_v12 }

</bundles_post_ra>
